<compile_context>
chip_gen: v7x
topology: tpu7x:2x2x1
jax: 0.10.0
libtpu: 0.0.40
codegen_flags: <defaults>
</compile_context>

<pallas_src>
import math

import jax
import jax.numpy as jnp
from jax.experimental import pallas as pl
from jax.experimental.pallas import tpu as pltpu


# -----------------------------------------------------------------------------
# Pallas kernel: one LightGCN propagation layer, tiled over the dense A_hat.
#
#   e_out   = A_hat @ e_in              (bf16 x bf16 -> f32 accumulate on MXU)
#   acc_out = acc_in + (A_hat @ e_in)   (running sum over layers, f32)
# -----------------------------------------------------------------------------
def _propagate_kernel(adj_ref, e_ref, acc_in_ref, e_out_ref, acc_out_ref,
                      acc_scr):
    # adj_ref    : (TM, TK)  bf16   tile of the normalized adjacency
    # e_ref      : (TK, DP)  bf16   current-layer embeddings (contraction slab)
    # acc_in_ref : (TM, DP)  f32    running layer-sum (input)
    # e_out_ref  : (TM, DP)  bf16   next-layer embeddings
    # acc_out_ref: (TM, DP)  f32    running layer-sum (output)
    # acc_scr    : (TM, DP)  f32    VMEM accumulator, resident across k axis
    k = pl.program_id(1)

    @pl.when(k == 0)
    def _init():
        acc_scr[...] = jnp.zeros_like(acc_scr)

    acc_scr[...] += jnp.dot(adj_ref[...], e_ref[...],
                            preferred_element_type=jnp.float32)

    @pl.when(k == pl.num_programs(1) - 1)
    def _finalize():
        e_new = acc_scr[...]
        e_out_ref[...] = e_new.astype(e_out_ref.dtype)
        acc_out_ref[...] = acc_in_ref[...] + e_new


def _round_up(x: int, m: int) -> int:
    return ((x + m - 1) // m) * m


def _build_propagate_call(npad: int, dpad: int, tm: int, tk: int):
    grid = (npad // tm, npad // tk)
    flops = 2 * npad * npad * dpad
    bytes_accessed = (npad * npad * 2              # adjacency tiles (bf16)
                      + npad * dpad * (2 + 2)      # e in / e out (bf16)
                      + npad * dpad * (4 + 4))     # acc in / acc out (f32)
    return pl.pallas_call(
        _propagate_kernel,
        out_shape=(
            jax.ShapeDtypeStruct((npad, dpad), jnp.bfloat16),   # e_out
            jax.ShapeDtypeStruct((npad, dpad), jnp.float32),    # acc_out
        ),
        grid_spec=pltpu.PrefetchScalarGridSpec(
            num_scalar_prefetch=0,
            grid=grid,
            in_specs=[
                pl.BlockSpec((tm, tk), lambda i, k: (i, k)),     # A_hat tile
                pl.BlockSpec((tk, dpad), lambda i, k: (k, 0)),   # e slab
                pl.BlockSpec((tm, dpad), lambda i, k: (i, 0)),   # acc_in
            ],
            out_specs=(
                pl.BlockSpec((tm, dpad), lambda i, k: (i, 0)),   # e_out
                pl.BlockSpec((tm, dpad), lambda i, k: (i, 0)),   # acc_out
            ),
            scratch_shapes=[pltpu.VMEM((tm, dpad), jnp.float32)],
        ),
        compiler_params=pltpu.CompilerParams(
            dimension_semantics=("parallel", "arbitrary"),
            vmem_limit_bytes=32 * 1024 * 1024,
        ),
        cost_estimate=pl.CostEstimate(
            flops=flops, transcendentals=0, bytes_accessed=bytes_accessed),
    )


def lightgcn_aggregate(norm_adj: jax.Array, ego_embeddings: jax.Array,
                       n_layers: int, *, tm: int = 256,
                       tk: int = 512) -> jax.Array:
    """LightGCN._aggregate: mean over layers 0..n_layers of A_hat propagation."""
    n_total, latent_dim = ego_embeddings.shape
    base = tm * tk // math.gcd(tm, tk)
    npad = _round_up(n_total, base)
    dpad = _round_up(latent_dim, 128)        # lane-dense on-chip feature axis

    adj_p = jnp.pad(norm_adj.astype(jnp.bfloat16),
                    ((0, npad - n_total), (0, npad - n_total)))
    e_p = jnp.pad(ego_embeddings.astype(jnp.bfloat16),
                  ((0, npad - n_total), (0, dpad - latent_dim)))
    acc_p = jnp.pad(ego_embeddings.astype(jnp.float32),
                    ((0, npad - n_total), (0, dpad - latent_dim)))

    propagate = _build_propagate_call(npad, dpad, tm, tk)
    for _ in range(n_layers):   # dense A_hat is streamed once per layer
        e_p, acc_p = propagate(adj_p, e_p, acc_p)

    mean = acc_p * (1.0 / float(n_layers + 1))
    return mean[:n_total, :latent_dim]


# -----------------------------------------------------------------------------
# Parameter / graph construction (plain-JAX glue, deterministic)
# -----------------------------------------------------------------------------
def xavier_uniform(key, shape):
    fan_out, fan_in = shape  # torch convention for a 2-D weight [out, in]
    bound = math.sqrt(6.0 / (fan_in + fan_out))
    return jax.random.uniform(key, shape, jnp.float32, -bound, bound)


def build_norm_adj(interactions: jax.Array, n_users: int, n_items: int):
    """Dense equivalent of LightGCN.get_norm_adj_mat: D^-0.5 A D^-0.5."""
    n_total = n_users + n_items
    a = jnp.zeros((n_total, n_total), dtype=jnp.float32)
    a = a.at[:n_users, n_users:].set(interactions)
    a = a.at[n_users:, :n_users].set(interactions.T)
    deg = jnp.sum((a > 0).astype(jnp.float32), axis=1) + 1e-7
    d_inv_sqrt = jnp.power(deg, -0.5)
    return d_inv_sqrt[:, None] * a * d_inv_sqrt[None, :]


def lightgcn_forward(user_embedding, item_embedding, norm_adj, n_layers, batch):
    """Mirrors LightGCN.forward(batch)."""
    n_users = user_embedding.shape[0]
    user = batch["userId"]
    pos_item = batch["itemId"]
    neg_item = batch["neg_itemId"]

    # _aggregate()  -- the hot path, in Pallas.
    ego = jnp.concatenate([user_embedding, item_embedding], axis=0)
    all_emb = lightgcn_aggregate(norm_adj, ego, n_layers)
    user_all, item_all = all_emb[:n_users], all_emb[n_users:]

    # Gathers + BPR scores in plain JAX: at B=8, D=32 a separate Pallas launch
    # costs far more than the ~1 KFLOP of compute (per perf review); XLA fuses
    # gather + multiply + reduce into one tiny fusion.
    u_emb = user_all[user]
    pos_emb = item_all[pos_item]
    neg_emb = item_all[neg_item]
    pos_scores = jnp.sum(u_emb * pos_emb, axis=-1)
    neg_scores = jnp.sum(u_emb * neg_emb, axis=-1)

    # Ego embeddings for the regularization term.
    u_ego = user_embedding[user]
    pos_ego = item_embedding[pos_item]
    neg_ego = item_embedding[neg_item]
    return pos_scores, neg_scores, (u_ego, pos_ego, neg_ego)


# -----------------------------------------------------------------------------
if __name__ == "__main__":
    key = jax.random.PRNGKey(0)
    k_user, k_item, k_inter, k_u, k_p, k_n = jax.random.split(key, 6)

    n_users = 16          # n_train_users
    n_items = 24
    latent_dim = 32       # config.model.embedding_size
    n_layers = 3          # config.model.n_layers
    batch_size = 8

    # Parameters (torch.nn.Embedding weights, xavier-uniform initialized)
    user_embedding = xavier_uniform(k_user, (n_users, latent_dim))
    item_embedding = xavier_uniform(k_item, (n_items, latent_dim))

    # Synthetic deterministic interaction matrix -> normalized adjacency
    interactions = jax.random.bernoulli(
        k_inter, p=0.2, shape=(n_users, n_items)).astype(jnp.float32)
    norm_adj = build_norm_adj(interactions, n_users, n_items)

    # Batch of (user, pos_item, neg_item) ids
    batch = {
        "userId": jax.random.randint(k_u, (batch_size,), 0, n_users),
        "itemId": jax.random.randint(k_p, (batch_size,), 0, n_items),
        "neg_itemId": jax.random.randint(k_n, (batch_size,), 0, n_items),
    }

    fwd = jax.jit(lightgcn_forward, static_argnums=(3,))
    pos_scores, neg_scores, egos = fwd(
        user_embedding, item_embedding, norm_adj, n_layers, batch)
    jax.block_until_ready((pos_scores, neg_scores, egos))

    # ---- Reference checks ---------------------------------------------------
    ego = jnp.concatenate([user_embedding, item_embedding], axis=0)

    # (a) matched-precision reference: bf16 A/E on the MXU, f32 accumulation,
    #     bf16 carried between layers -- mirrors the kernel numerics.
    adj_bf = norm_adj.astype(jnp.bfloat16)
    e_bf = ego.astype(jnp.bfloat16)
    acc = ego.astype(jnp.float32)
    for _ in range(n_layers):
        e_f32 = jnp.dot(adj_bf, e_bf, preferred_element_type=jnp.float32)
        acc = acc + e_f32
        e_bf = e_f32.astype(jnp.bfloat16)
    mean_ref = acc / (n_layers + 1)

    mean_pallas = lightgcn_aggregate(norm_adj, ego, n_layers)
    assert jnp.allclose(mean_pallas, mean_ref, atol=2e-3), "aggregate mismatch"

    u_ref = mean_ref[:n_users][batch["userId"]]
    p_ref = mean_ref[n_users:][batch["itemId"]]
    n_ref = mean_ref[n_users:][batch["neg_itemId"]]
    assert jnp.allclose(pos_scores, jnp.sum(u_ref * p_ref, axis=1), atol=2e-3)
    assert jnp.allclose(neg_scores, jnp.sum(u_ref * n_ref, axis=1), atol=2e-3)

    # (b) loose semantic check against the original full-f32 module math.
    e32, acc32 = ego, ego
    for _ in range(n_layers):
        e32 = norm_adj @ e32
        acc32 = acc32 + e32
    mean32 = acc32 / (n_layers + 1)
    u32 = mean32[:n_users][batch["userId"]]
    p32 = mean32[n_users:][batch["itemId"]]
    n32 = mean32[n_users:][batch["neg_itemId"]]
    assert jnp.allclose(pos_scores, jnp.sum(u32 * p32, axis=1), atol=5e-2)
    assert jnp.allclose(neg_scores, jnp.sum(u32 * n32, axis=1), atol=5e-2)

    print("KERNEL_OK")
</pallas_src>

<mosaic_0001>
module attributes {stable_mosaic.version = 11 : i64} {
  func.func @_propagate_kernel(%arg0: i32, %arg1: i32, %arg2: memref<256x512xbf16, #tpu.memory_space<vmem>>, %arg3: memref<512x128xbf16, #tpu.memory_space<vmem>>, %arg4: memref<256x128xf32, #tpu.memory_space<vmem>>, %arg5: memref<256x128xbf16, #tpu.memory_space<vmem>>, %arg6: memref<256x128xf32, #tpu.memory_space<vmem>>, %arg7: memref<256x128xf32, #tpu.memory_space<vmem>>) attributes {dimension_semantics = [#tpu.dimension_semantics<parallel>, #tpu.dimension_semantics<arbitrary>], iteration_bounds = array<i64: 2, 1>, scalar_prefetch = 0 : i64, scratch_operands = 1 : i64, tpu.core_type = #tpu.core_type<tc>, window_params = [{transform_indices = @transform_0, window_bounds = array<i64: 256, 512>}, {transform_indices = @transform_1, window_bounds = array<i64: 512, 128>}, {transform_indices = @transform_2, window_bounds = array<i64: 256, 128>}, {transform_indices = @transform_3, window_bounds = array<i64: 256, 128>}, {transform_indices = @transform_4, window_bounds = array<i64: 256, 128>}]} {
    %c0_i32 = arith.constant 0 : i32
    %0 = arith.cmpi eq, %arg1, %c0_i32 : i32
    %1 = arith.extui %0 : i1 to i32
    %c0_i32_0 = arith.constant 0 : i32
    %2 = arith.cmpi ne, %1, %c0_i32_0 : i32
    scf.if %2 {
      %cst_10 = arith.constant 0.000000e+00 : f32
      %12 = vector.broadcast %cst_10 : f32 to vector<256x128xf32>
      %c0_11 = arith.constant 0 : index
      %c0_12 = arith.constant 0 : index
      %13 = vector.load %arg7[%c0_11, %c0_12] : memref<256x128xf32, #tpu.memory_space<vmem>>, vector<256x128xf32>
      tpu.vector_store %arg7[%c0_11, %c0_12], %12 {strides = array<i32>} : memref<256x128xf32, #tpu.memory_space<vmem>>, vector<256x128xf32>,
    } else {
    }
    %c0 = arith.constant 0 : index
    %c0_1 = arith.constant 0 : index
    %3 = vector.load %arg7[%c0, %c0_1] : memref<256x128xf32, #tpu.memory_space<vmem>>, vector<256x128xf32>
    %c0_2 = arith.constant 0 : index
    %c0_3 = arith.constant 0 : index
    %4 = vector.load %arg2[%c0_2, %c0_3] : memref<256x512xbf16, #tpu.memory_space<vmem>>, vector<256x512xbf16>
    %c0_4 = arith.constant 0 : index
    %c0_5 = arith.constant 0 : index
    %5 = vector.load %arg3[%c0_4, %c0_5] : memref<512x128xbf16, #tpu.memory_space<vmem>>, vector<512x128xbf16>
    %cst = arith.constant dense<0.000000e+00> : vector<256x128xf32>
    %6 = tpu.matmul %4, %5, %cst {dimension_numbers = #tpu.dot_dimension_numbers<[1], [0], [0], [1], [0, 0, 1, 1], [], []>} : vector<256x512xbf16>, vector<512x128xbf16>, vector<256x128xf32> -> vector<256x128xf32>
    %7 = arith.addf %3, %6 : vector<256x128xf32>
    %c0_6 = arith.constant 0 : index
    %c0_7 = arith.constant 0 : index
    %8 = vector.load %arg7[%c0_6, %c0_7] : memref<256x128xf32, #tpu.memory_space<vmem>>, vector<256x128xf32>
    tpu.vector_store %arg7[%c0_6, %c0_7], %7 {strides = array<i32>} : memref<256x128xf32, #tpu.memory_space<vmem>>, vector<256x128xf32>,
    %c0_i32_8 = arith.constant 0 : i32
    %9 = arith.cmpi eq, %arg1, %c0_i32_8 : i32
    %10 = arith.extui %9 : i1 to i32
    %c0_i32_9 = arith.constant 0 : i32
    %11 = arith.cmpi ne, %10, %c0_i32_9 : i32
    scf.if %11 {
      %c0_10 = arith.constant 0 : index
      %c0_11 = arith.constant 0 : index
      %12 = vector.load %arg7[%c0_10, %c0_11] : memref<256x128xf32, #tpu.memory_space<vmem>>, vector<256x128xf32>
      %13 = arith.truncf %12 : vector<256x128xf32> to vector<256x128xbf16>
      %c0_12 = arith.constant 0 : index
      %c0_13 = arith.constant 0 : index
      %14 = vector.load %arg5[%c0_12, %c0_13] : memref<256x128xbf16, #tpu.memory_space<vmem>>, vector<256x128xbf16>
      tpu.vector_store %arg5[%c0_12, %c0_13], %13 {strides = array<i32>} : memref<256x128xbf16, #tpu.memory_space<vmem>>, vector<256x128xbf16>,
      %c0_14 = arith.constant 0 : index
      %c0_15 = arith.constant 0 : index
      %15 = vector.load %arg4[%c0_14, %c0_15] : memref<256x128xf32, #tpu.memory_space<vmem>>, vector<256x128xf32>
      %16 = arith.addf %15, %12 : vector<256x128xf32>
      %c0_16 = arith.constant 0 : index
      %c0_17 = arith.constant 0 : index
      %17 = vector.load %arg6[%c0_16, %c0_17] : memref<256x128xf32, #tpu.memory_space<vmem>>, vector<256x128xf32>
      tpu.vector_store %arg6[%c0_16, %c0_17], %16 {strides = array<i32>} : memref<256x128xf32, #tpu.memory_space<vmem>>, vector<256x128xf32>,
    } else {
    }
    return
  }
  func.func @transform_0(%arg0: i32, %arg1: i32) -> (i32, i32) {
    %c0_i32 = arith.constant 0 : i32
    return %arg0, %arg1 : i32, i32
  }
  func.func @transform_1(%arg0: i32, %arg1: i32) -> (i32, i32) {
    %c0_i32 = arith.constant 0 : i32
    %c0_i32_0 = arith.constant 0 : i32
    return %arg1, %c0_i32 : i32, i32
  }
  func.func @transform_2(%arg0: i32, %arg1: i32) -> (i32, i32) {
    %c0_i32 = arith.constant 0 : i32
    %c0_i32_0 = arith.constant 0 : i32
    return %arg0, %c0_i32 : i32, i32
  }
  func.func @transform_3(%arg0: i32, %arg1: i32) -> (i32, i32) {
    %c0_i32 = arith.constant 0 : i32
    %c0_i32_0 = arith.constant 0 : i32
    return %arg0, %c0_i32 : i32, i32
  }
  func.func @transform_4(%arg0: i32, %arg1: i32) -> (i32, i32) {
    %c0_i32 = arith.constant 0 : i32
    %c0_i32_0 = arith.constant 0 : i32
    return %arg0, %c0_i32 : i32, i32
  }
}

module attributes {stable_mosaic.version = 11 : i64} {
  func.func @_propagate_kernel(%arg0: i32, %arg1: i32, %arg2: memref<256x512xbf16, #tpu.memory_space<vmem>>, %arg3: memref<512x128xbf16, #tpu.memory_space<vmem>>, %arg4: memref<256x128xf32, #tpu.memory_space<vmem>>, %arg5: memref<256x128xbf16, #tpu.memory_space<vmem>>, %arg6: memref<256x128xf32, #tpu.memory_space<vmem>>, %arg7: memref<256x128xf32, #tpu.memory_space<vmem>>) attributes {dimension_semantics = [#tpu.dimension_semantics<parallel>, #tpu.dimension_semantics<arbitrary>], iteration_bounds = array<i64: 2, 1>, scalar_prefetch = 0 : i64, scratch_operands = 1 : i64, tpu.core_type = #tpu.core_type<tc>, window_params = [{transform_indices = @transform_0, window_bounds = array<i64: 256, 512>}, {transform_indices = @transform_1, window_bounds = array<i64: 512, 128>}, {transform_indices = @transform_2, window_bounds = array<i64: 256, 128>}, {transform_indices = @transform_3, window_bounds = array<i64: 256, 128>}, {transform_indices = @transform_4, window_bounds = array<i64: 256, 128>}]} {
    %c0_i32 = arith.constant 0 : i32
    %0 = arith.cmpi eq, %arg1, %c0_i32 : i32
    %1 = arith.extui %0 : i1 to i32
    %c0_i32_0 = arith.constant 0 : i32
    %2 = arith.cmpi ne, %1, %c0_i32_0 : i32
    scf.if %2 {
      %cst_10 = arith.constant 0.000000e+00 : f32
      %12 = vector.broadcast %cst_10 : f32 to vector<256x128xf32>
      %c0_11 = arith.constant 0 : index
      %c0_12 = arith.constant 0 : index
      %13 = vector.load %arg7[%c0_11, %c0_12] : memref<256x128xf32, #tpu.memory_space<vmem>>, vector<256x128xf32>
      tpu.vector_store %arg7[%c0_11, %c0_12], %12 {strides = array<i32>} : memref<256x128xf32, #tpu.memory_space<vmem>>, vector<256x128xf32>,
    } else {
    }
    %c0 = arith.constant 0 : index
    %c0_1 = arith.constant 0 : index
    %3 = vector.load %arg7[%c0, %c0_1] : memref<256x128xf32, #tpu.memory_space<vmem>>, vector<256x128xf32>
    %c0_2 = arith.constant 0 : index
    %c0_3 = arith.constant 0 : index
    %4 = vector.load %arg2[%c0_2, %c0_3] : memref<256x512xbf16, #tpu.memory_space<vmem>>, vector<256x512xbf16>
    %c0_4 = arith.constant 0 : index
    %c0_5 = arith.constant 0 : index
    %5 = vector.load %arg3[%c0_4, %c0_5] : memref<512x128xbf16, #tpu.memory_space<vmem>>, vector<512x128xbf16>
    %cst = arith.constant dense<0.000000e+00> : vector<256x128xf32>
    %6 = tpu.matmul %4, %5, %cst {dimension_numbers = #tpu.dot_dimension_numbers<[1], [0], [0], [1], [0, 0, 1, 1], [], []>} : vector<256x512xbf16>, vector<512x128xbf16>, vector<256x128xf32> -> vector<256x128xf32>
    %7 = arith.addf %3, %6 : vector<256x128xf32>
    %c0_6 = arith.constant 0 : index
    %c0_7 = arith.constant 0 : index
    %8 = vector.load %arg7[%c0_6, %c0_7] : memref<256x128xf32, #tpu.memory_space<vmem>>, vector<256x128xf32>
    tpu.vector_store %arg7[%c0_6, %c0_7], %7 {strides = array<i32>} : memref<256x128xf32, #tpu.memory_space<vmem>>, vector<256x128xf32>,
    %c0_i32_8 = arith.constant 0 : i32
    %9 = arith.cmpi eq, %arg1, %c0_i32_8 : i32
    %10 = arith.extui %9 : i1 to i32
    %c0_i32_9 = arith.constant 0 : i32
    %11 = arith.cmpi ne, %10, %c0_i32_9 : i32
    scf.if %11 {
      %c0_10 = arith.constant 0 : index
      %c0_11 = arith.constant 0 : index
      %12 = vector.load %arg7[%c0_10, %c0_11] : memref<256x128xf32, #tpu.memory_space<vmem>>, vector<256x128xf32>
      %13 = arith.truncf %12 : vector<256x128xf32> to vector<256x128xbf16>
      %c0_12 = arith.constant 0 : index
      %c0_13 = arith.constant 0 : index
      %14 = vector.load %arg5[%c0_12, %c0_13] : memref<256x128xbf16, #tpu.memory_space<vmem>>, vector<256x128xbf16>
      tpu.vector_store %arg5[%c0_12, %c0_13], %13 {strides = array<i32>} : memref<256x128xbf16, #tpu.memory_space<vmem>>, vector<256x128xbf16>,
      %c0_14 = arith.constant 0 : index
      %c0_15 = arith.constant 0 : index
      %15 = vector.load %arg4[%c0_14, %c0_15] : memref<256x128xf32, #tpu.memory_space<vmem>>, vector<256x128xf32>
      %16 = arith.addf %15, %12 : vector<256x128xf32>
      %c0_16 = arith.constant 0 : index
      %c0_17 = arith.constant 0 : index
      %17 = vector.load %arg6[%c0_16, %c0_17] : memref<256x128xf32, #tpu.memory_space<vmem>>, vector<256x128xf32>
      tpu.vector_store %arg6[%c0_16, %c0_17], %16 {strides = array<i32>} : memref<256x128xf32, #tpu.memory_space<vmem>>, vector<256x128xf32>,
    } else {
    }
    return
  }
  func.func @transform_0(%arg0: i32, %arg1: i32) -> (i32, i32) {
    %c0_i32 = arith.constant 0 : i32
    return %arg0, %arg1 : i32, i32
  }
  func.func @transform_1(%arg0: i32, %arg1: i32) -> (i32, i32) {
    %c0_i32 = arith.constant 0 : i32
    %c0_i32_0 = arith.constant 0 : i32
    return %arg1, %c0_i32 : i32, i32
  }
  func.func @transform_2(%arg0: i32, %arg1: i32) -> (i32, i32) {
    %c0_i32 = arith.constant 0 : i32
    %c0_i32_0 = arith.constant 0 : i32
    return %arg0, %c0_i32 : i32, i32
  }
  func.func @transform_3(%arg0: i32, %arg1: i32) -> (i32, i32) {
    %c0_i32 = arith.constant 0 : i32
    %c0_i32_0 = arith.constant 0 : i32
    return %arg0, %c0_i32 : i32, i32
  }
  func.func @transform_4(%arg0: i32, %arg1: i32) -> (i32, i32) {
    %c0_i32 = arith.constant 0 : i32
    %c0_i32_0 = arith.constant 0 : i32
    return %arg0, %c0_i32 : i32, i32
  }
}

</mosaic_0001>

<bundles_post_ra>
// kernel: lightgcn_forward.5
= control target key start
LH: loop header
LB: loop body
LE: loop exit
PB: predicated region body
PF: predicated region fallthrough
CT: control target
= control target key end

     0   :  { %10 = vsyncpa [#allocation4], 0  ;;  %s2995_s0 = inlined_call_operand.vmem [shape: bf16[512,512], index: 0, kind: input, shape index: {}]   ;;  %s2996_s1 = inlined_call_operand.vmem [shape: bf16[512,128], index: 1, kind: input, shape index: {}]   ;;  %s2997_s2 = inlined_call_operand.vmem [shape: f32[512,128], index: 2, kind: input, shape index: {}]   ;;  %s2998_s3 = inlined_call_operand.hbm [shape: bf16[512,128], index: 3, kind: output, shape index: {0}]   ;;  %s2999_s4 = inlined_call_operand.vmem [shape: f32[512,128], index: 4, kind: output, shape index: {1}]  }
   0x1   :  { %12 = vsyncpa [#allocation4 + $0x1], 0  ;;  %s2618_s15 = smov 0   ;;  %s2620_s16 = smov 0  }
   0x2   :  { %s2622_s17 = smov 0   ;;  %s2624_s18 = smov 0  }
   0x3   :  { %s2626_s19 = smov 0   ;;  %s2628_s20 = smov 0  }
   0x4 LB: > { %s1825_s21 = sadd.s32 4294967295, %s2588_s20   ;;  %s1826_s22 = sadd.s32 4294967294, %s2588_s20   ;;  %s2588_s20 = sphi %s2628_s20, %s18_s20   ;;  %s2584_s19 = sphi %s2626_s19, %s3006_s19   ;;  %s2580_s18 = sphi %s2624_s18, %s3005_s18   ;;  %s2576_s17 = sphi %s2622_s17, %s3004_s17   ;;  %s2572_s16 = sphi %s2620_s16, %s3003_s16   ;;  %s2568_s15 = sphi %s2618_s15, %s3002_s15  }
   0x5   : > { %s30_s23 = sadd.s32 1, %s2584_s19  ;;  %s117_s24 = sadd.s32 1, %s2576_s17 }
   0x6   : > { %p32_p0 = scmp.ge.s32.totalorder %s30_s23, 2  ;;  %p127_p1 = scmp.ne.s32.totalorder %s2576_s17, %s2572_s16 }
   0x7   : > { %p128_p2 = scmp.eq.s32.totalorder %s1825_s21, 1  ;;  %p133_p3 = scmp.ne.s32.totalorder %s2572_s16, %s2568_s15 }
   0x8   : > { %s3008_s23 = smov (%p32_p0, %s30_s23), 0  ;;  %p134_p5 = scmp.eq.s32.totalorder %s1826_s22, 1 }
   0x9   : > { %p2658_p4 = por %p128_p2, %p127_p1  ;;  %s114_s26 = ssub.s32 %s2584_s19, %s3008_s23 }
   0xa   : > { %p1830_p6 = scmp.ge.s32.totalorder %s2588_s20, 1  ;;  %p115_p7 = scmp.eq.s32.totalorder %s114_s26, 0 }
   0xb   : > { %p2665_p8 = por %p134_p5, %p133_p3  ;;  %p211_p9 = scmp.lt.s32.totalorder %s2588_s20, 3 }
   0xc   : > { %s2671_s28 = scalar_select %p115_p7, %s2576_s17, %s117_s24  }
   0xd   : > { %p212_p10 = pnand %p1830_p6, %p211_p9 }
   0xe   : > { %v2382_v0 = vld [vmem:[%s2996_s1 + $0x40] sm:$0xff] (!%p212_p10)   ;;  %v2386_v4 = vld [vmem:[%s2996_s1 + $0x48] sm:$0xff] (!%p212_p10)   ;;  %v2390_v8 = vld [vmem:[%s2996_s1 + $0x50] sm:$0xff] (!%p212_p10)   ;;  %s1832_s29 = sshll.u32 (!%p212_p10), %s2580_s18, 5  ;;  %s247_s14 = sand.u32 (!%p212_p10), 1, %s2572_s16  }
   0xf   : > { %215 = sbr.rel (%p212_p10) target bundleno = 405 (0x195), region = 32  ;;  %v2383_v1 = vld [vmem:[%s2996_s1 + $0xc0] sm:$0xff] (!%p212_p10)   ;;  %2101 = vmatprep.subr.bf16.mxu0 (!%p212_p10), %v2382_v0  ;;  %v2387_v5 = vld [vmem:[%s2996_s1 + $0xc8] sm:$0xff] (!%p212_p10)   ;;  %v2391_v9 = vld [vmem:[%s2996_s1 + $0xd0] sm:$0xff] (!%p212_p10)   ;;  %p259_p11 = scmp.lt.s32.totalorder (!%p212_p10), %s1832_s29, 63 }
  0x10   : > { %v2384_v2 = vld [vmem:[%s2996_s1] sm:$0xff] (!%p212_p10)   ;;  %2213 = vmatprep.subr.bf16.mxu1 (!%p212_p10), %v2383_v1  ;;  %v2388_v6 = vld [vmem:[%s2996_s1 + $0x8] sm:$0xff] (!%p212_p10)   ;;  %v2392_v10 = vld [vmem:[%s2996_s1 + $0x10] sm:$0xff] (!%p212_p10)   ;;  %s2005_s30 = sshll.u32 (!%p212_p10), %s2580_s18, 11  ;;  %s2949_s18 = scalar_lea.sflag (!%p212_p10), [#allocation4], %s247_s14 }
  0x11   : > { %v2385_v3 = vld [vmem:[%s2996_s1 + $0x80] sm:$0xff] (!%p212_p10)   ;;  %2102 = vmatpush3.bf16.msra.mxu0 (!%p212_p10), %v2384_v2  ;;  %v2389_v7 = vld [vmem:[%s2996_s1 + $0x88] sm:$0xff] (!%p212_p10)   ;;  %v2393_v11 = vld [vmem:[%s2996_s1 + $0x90] sm:$0xff] (!%p212_p10)   ;;  %s2940_s8 = scalar_lea.hbm (!%p212_p10), %s2998_s3, %s2005_s30 }
  0x12   : > { %2214 = vmatpush3.bf16.msra.mxu1 (!%p212_p10), %v2385_v3  ;;  %2103 = vmatprep.subr.bf16.mxu0 (!%p212_p10), %v2386_v4  ;;  %v2394_v12 = vld [vmem:[%s2996_s1 + $0x58] sm:$0xff] (!%p212_p10)   ;;  %v2398_v16 = vld [vmem:[%s2996_s1 + $0x60] sm:$0xff] (!%p212_p10)   ;;  %v2402_v20 = vld [vmem:[%s2996_s1 + $0x68] sm:$0xff] (!%p212_p10)  }
  0x13   : > { %2215 = vmatprep.subr.bf16.mxu1 (!%p212_p10), %v2387_v5  ;;  %v2395_v13 = vld [vmem:[%s2996_s1 + $0xd8] sm:$0xff] (!%p212_p10)   ;;  %v2399_v17 = vld [vmem:[%s2996_s1 + $0xe0] sm:$0xff] (!%p212_p10)   ;;  %v2403_v21 = vld [vmem:[%s2996_s1 + $0xe8] sm:$0xff] (!%p212_p10)  }
  0x14   : > { %v2396_v14 = vld [vmem:[%s2996_s1 + $0x18] sm:$0xff] (!%p212_p10)   ;;  %v2400_v18 = vld [vmem:[%s2996_s1 + $0x20] sm:$0xff] (!%p212_p10)   ;;  %v2404_v22 = vld [vmem:[%s2996_s1 + $0x28] sm:$0xff] (!%p212_p10)  }
  0x15   : > { %2104 = vmatpush3.bf16.msra.mxu0 (!%p212_p10), %v2388_v6  ;;  %v2397_v15 = vld [vmem:[%s2996_s1 + $0x98] sm:$0xff] (!%p212_p10)   ;;  %v2401_v19 = vld [vmem:[%s2996_s1 + $0xa0] sm:$0xff] (!%p212_p10)   ;;  %v2405_v23 = vld [vmem:[%s2996_s1 + $0xa8] sm:$0xff] (!%p212_p10)  }
  0x16   : > { %2216 = vmatpush3.bf16.msra.mxu1 %v2389_v7  ;;  %2105 = vmatprep.subr.bf16.mxu0 %v2390_v8  ;;  %s3010_s29 = smov (!%p259_p11, %s1832_s29), 63  ;;  %v2406_v24 = vld [vmem:[%s2996_s1 + $0x70] sm:$0xff]   ;;  %v2410_v28 = vld [vmem:[%s2996_s1 + $0x78] sm:$0xff]  }
  0x17   : > { %2217 = vmatprep.subr.bf16.mxu1 %v2391_v9  ;;  %v2407_v25 = vld [vmem:[%s2996_s1 + $0xf0] sm:$0xff]   ;;  %s1972_s11 = sshll.u32 %s3010_s29, 4  ;;  %v2411_v29 = vld [vmem:[%s2996_s1 + $0xf8] sm:$0xff]   ;;  %s1836_s10 = sshll.u32 %s3010_s29, 3 }
  0x18   : > { %v2408_v26 = vld [vmem:[%s2996_s1 + $0x30] sm:$0xff]   ;;  %s2770_s5 = scalar_lea.vmem %s2995_s0, %s1972_s11  ;;  %v2412_v30 = vld [vmem:[%s2996_s1 + $0x38] sm:$0xff]   ;;  %s2846_s13 = scalar_lea.vmem %s2997_s2, %s1836_s10 }
  0x19   : > { %2106 = vmatpush3.bf16.msra.mxu0 %v2392_v10  ;;  %v2409_v27 = vld [vmem:[%s2996_s1 + $0xb0] sm:$0xff]   ;;  %v2413_v31 = vld [vmem:[%s2996_s1 + $0xb8] sm:$0xff]   ;;  %s1831_s29 = sshll.u32 %s247_s14, 7  ;;  %s2855_s24 = scalar_lea.vmem %s2999_s4, %s1836_s10 }
  0x1a   : > { %2218 = vmatpush3.bf16.msra.mxu1 %v2393_v11  ;;  %2107 = vmatprep.subr.bf16.mxu0 %v2394_v12  ;;  %v2414_v32 = vld [vmem:[%s2770_s5] ss:$16 sps:$4 sm:$0xff]   ;;  %v2416_v33 = vld [vmem:[%s2770_s5 + $0x4] ss:$16 sps:$4 sm:$0xff]   ;;  %v2417_v34 = vld [vmem:[%s2770_s5 + $0x8] ss:$16 sps:$4 sm:$0xff]  }
  0x1b   : > { %2219 = vmatprep.subr.bf16.mxu1 %v2395_v13  ;;  %v2419_v35 = vld [vmem:[%s2770_s5 + $0xc] ss:$16 sps:$4 sm:$0xff]   ;;  %1029 = vmatprep.mubr.bf16.mxu0 %v2416_v33  ;;  %v2420_v36 = vld [vmem:[%s2770_s5 + $0x24] ss:$16 sps:$4 sm:$0xff]   ;;  %v2424_v38 = vld [vmem:[%s2770_s5 + $0x20] ss:$16 sps:$4 sm:$0xff]  }
  0x1c   : > { %1190 = vmatprep.mubr.bf16.mxu1 %v2419_v35  ;;  %v2422_v37 = vld [vmem:[%s2770_s5 + $0x2c] ss:$16 sps:$4 sm:$0xff]   ;;  %v2425_v39 = vld [vmem:[%s2770_s5 + $0x28] ss:$16 sps:$4 sm:$0xff]   ;;  %v2426_v40 = vld [vmem:[%s2770_s5 + $0x44] ss:$16 sps:$4 sm:$0xff]  }
  0x1d   : > { %2108 = vmatpush3.bf16.msra.mxu0 %v2396_v14  ;;  %v2428_v41 = vld [vmem:[%s2770_s5 + $0x4c] ss:$16 sps:$4 sm:$0xff]   ;;  %v2430_v42 = vld [vmem:[%s2770_s5 + $0x40] ss:$16 sps:$4 sm:$0xff]   ;;  %v2431_v43 = vld [vmem:[%s2770_s5 + $0x48] ss:$16 sps:$4 sm:$0xff]  }
  0x1e   : > { %2220 = vmatpush3.bf16.msra.mxu1 %v2397_v15  ;;  %2109 = vmatprep.subr.bf16.mxu0 %v2398_v16  ;;  %v2432_v44 = vld [vmem:[%s2770_s5 + $0x64] ss:$16 sps:$4 sm:$0xff]   ;;  %v2434_v45 = vld [vmem:[%s2770_s5 + $0x6c] ss:$16 sps:$4 sm:$0xff]   ;;  %v2436_v46 = vld [vmem:[%s2770_s5 + $0x60] ss:$16 sps:$4 sm:$0xff]  }
  0x1f   : > { %2221 = vmatprep.subr.bf16.mxu1 %v2399_v17  ;;  %v2437_v47 = vld [vmem:[%s2770_s5 + $0x68] ss:$16 sps:$4 sm:$0xff]   ;;  %v2438_v48 = vld [vmem:[%s2770_s5 + $0x84] ss:$16 sps:$4 sm:$0xff]   ;;  %v2440_v49 = vld [vmem:[%s2770_s5 + $0x8c] ss:$16 sps:$4 sm:$0xff]  }
  0x20   : > { %v2442_v50 = vld [vmem:[%s2770_s5 + $0x80] ss:$16 sps:$4 sm:$0xff]   ;;  %v2443_v51 = vld [vmem:[%s2770_s5 + $0x88] ss:$16 sps:$4 sm:$0xff]   ;;  %v2444_v52 = vld [vmem:[%s2770_s5 + $0xa4] ss:$16 sps:$4 sm:$0xff]  }
  0x21   : > { %2110 = vmatpush3.bf16.msra.mxu0 %v2400_v18  ;;  %v2446_v53 = vld [vmem:[%s2770_s5 + $0xac] ss:$16 sps:$4 sm:$0xff]   ;;  %v2448_v54 = vld [vmem:[%s2770_s5 + $0xa0] ss:$16 sps:$4 sm:$0xff]   ;;  %v2449_v55 = vld [vmem:[%s2770_s5 + $0xa8] ss:$16 sps:$4 sm:$0xff]  }
  0x22   : > { %2222 = vmatpush3.bf16.msra.mxu1 %v2401_v19  ;;  %2111 = vmatprep.subr.bf16.mxu0 %v2402_v20  ;;  %v2450_v56 = vld [vmem:[%s2770_s5 + $0xc4] ss:$16 sps:$4 sm:$0xff]   ;;  %v2452_v57 = vld [vmem:[%s2770_s5 + $0xcc] ss:$16 sps:$4 sm:$0xff]   ;;  %v2454_v58 = vld [vmem:[%s2770_s5 + $0xc0] ss:$16 sps:$4 sm:$0xff]  }
  0x23   : > { %2223 = vmatprep.subr.bf16.mxu1 %v2403_v21  ;;  %v2455_v59 = vld [vmem:[%s2770_s5 + $0xc8] ss:$16 sps:$4 sm:$0xff]   ;;  %v2456_v60 = vld [vmem:[%s2770_s5 + $0xe4] ss:$16 sps:$4 sm:$0xff]   ;;  %v2458_v61 = vld [vmem:[%s2770_s5 + $0xec] ss:$16 sps:$4 sm:$0xff]  }
  0x24   : > { %v2460_v62 = vld [vmem:[%s2770_s5 + $0xe0] ss:$16 sps:$4 sm:$0xff]   ;;  %v2461_v63 = vld [vmem:[%s2770_s5 + $0xe8] ss:$16 sps:$4 sm:$0xff]   ;;  %v2462_v0 = vld [vmem:[%s2770_s5 + $0x104] ss:$16 sps:$4 sm:$0xff]  }
  0x25   : > { %2112 = vmatpush3.bf16.msra.mxu0 %v2404_v22  ;;  %v2464_v1 = vld [vmem:[%s2770_s5 + $0x10c] ss:$16 sps:$4 sm:$0xff]   ;;  %v2466_v2 = vld [vmem:[%s2770_s5 + $0x100] ss:$16 sps:$4 sm:$0xff]   ;;  %v2467_v3 = vld [vmem:[%s2770_s5 + $0x108] ss:$16 sps:$4 sm:$0xff]  }
  0x26   : > { %2224 = vmatpush3.bf16.msra.mxu1 %v2405_v23  ;;  %2113 = vmatprep.subr.bf16.mxu0 %v2406_v24  ;;  %v2468_v4 = vld [vmem:[%s2770_s5 + $0x124] ss:$16 sps:$4 sm:$0xff]   ;;  %v2470_v5 = vld [vmem:[%s2770_s5 + $0x12c] ss:$16 sps:$4 sm:$0xff]   ;;  %v2472_v6 = vld [vmem:[%s2770_s5 + $0x120] ss:$16 sps:$4 sm:$0xff]  }
  0x27   : > { %2225 = vmatprep.subr.bf16.mxu1 %v2407_v25  ;;  %v2473_v7 = vld [vmem:[%s2770_s5 + $0x128] ss:$16 sps:$4 sm:$0xff]   ;;  %v2474_v8 = vld [vmem:[%s2770_s5 + $0x144] ss:$16 sps:$4 sm:$0xff]   ;;  %v2476_v9 = vld [vmem:[%s2770_s5 + $0x14c] ss:$16 sps:$4 sm:$0xff]  }
  0x28   : > { %v2478_v10 = vld [vmem:[%s2770_s5 + $0x140] ss:$16 sps:$4 sm:$0xff]   ;;  %v2479_v11 = vld [vmem:[%s2770_s5 + $0x148] ss:$16 sps:$4 sm:$0xff]   ;;  %v2480_v12 = vld [vmem:[%s2770_s5 + $0x164] ss:$16 sps:$4 sm:$0xff]  }
  0x29   : > { %2114 = vmatpush3.bf16.msra.mxu0 %v2408_v26  ;;  %v2482_v13 = vld [vmem:[%s2770_s5 + $0x16c] ss:$16 sps:$4 sm:$0xff]   ;;  %v2484_v14 = vld [vmem:[%s2770_s5 + $0x160] ss:$16 sps:$4 sm:$0xff]   ;;  %v2485_v15 = vld [vmem:[%s2770_s5 + $0x168] ss:$16 sps:$4 sm:$0xff]  }
  0x2a   : > { %2226 = vmatpush3.bf16.msra.mxu1 %v2409_v27  ;;  %2115 = vmatprep.subr.bf16.mxu0 %v2410_v28  ;;  %v2486_v16 = vld [vmem:[%s2770_s5 + $0x184] ss:$16 sps:$4 sm:$0xff]   ;;  %v2488_v17 = vld [vmem:[%s2770_s5 + $0x18c] ss:$16 sps:$4 sm:$0xff]   ;;  %v2490_v18 = vld [vmem:[%s2770_s5 + $0x180] ss:$16 sps:$4 sm:$0xff]  }
  0x2b   : > { %2227 = vmatprep.subr.bf16.mxu1 %v2411_v29  ;;  %v2491_v19 = vld [vmem:[%s2770_s5 + $0x188] ss:$16 sps:$4 sm:$0xff]   ;;  %v2492_v20 = vld [vmem:[%s2770_s5 + $0x1a4] ss:$16 sps:$4 sm:$0xff]   ;;  %v2494_v21 = vld [vmem:[%s2770_s5 + $0x1ac] ss:$16 sps:$4 sm:$0xff]  }
  0x2c   : > { %v2496_v22 = vld [vmem:[%s2770_s5 + $0x1a0] ss:$16 sps:$4 sm:$0xff]   ;;  %v2497_v23 = vld [vmem:[%s2770_s5 + $0x1a8] ss:$16 sps:$4 sm:$0xff]   ;;  %v2498_v24 = vld [vmem:[%s2770_s5 + $0x1c4] ss:$16 sps:$4 sm:$0xff]  }
  0x2d   : > { %2116 = vmatpush3.bf16.msra.mxu0 %v2412_v30  ;;  %v2500_v25 = vld [vmem:[%s2770_s5 + $0x1cc] ss:$16 sps:$4 sm:$0xff]   ;;  %v2502_v26 = vld [vmem:[%s2770_s5 + $0x1c0] ss:$16 sps:$4 sm:$0xff]   ;;  %v2503_v27 = vld [vmem:[%s2770_s5 + $0x1c8] ss:$16 sps:$4 sm:$0xff]  }
  0x2e   : > { %2228 = vmatpush3.bf16.msra.mxu1 %v2413_v31  ;;  %v2504_v28 = vld [vmem:[%s2770_s5 + $0x1e4] ss:$16 sps:$4 sm:$0xff]   ;;  %v2506_v29 = vld [vmem:[%s2770_s5 + $0x1ec] ss:$16 sps:$4 sm:$0xff]   ;;  %v2508_v30 = vld [vmem:[%s2770_s5 + $0x1e0] ss:$16 sps:$4 sm:$0xff]  }
  0x2f   : > { %v2509_v31 = vld [vmem:[%s2770_s5 + $0x1e8] ss:$16 sps:$4 sm:$0xff]   ;;  %s2859_s26 = scalar_lea.vmem [#allocation3], %s1831_s29  ;;  %s2590_s10 = smov [#allocation3]  }
  0x30   : > { %1030 = vmatmul.mubr.bf16.vlgmr.msra.gmra.mrb[0].mxu0 %v2414_v32  ;;  %s1693_s5 = sshll.u32 %s2859_s26, 4  ;;  %s2514_s11 = sshll.u32 %s2590_s10, 4  ;;  %s2942_s5 = int_to_ptr.vmem [resolvable:$true] %s1693_s5  ;;  %s2515_s11 = int_to_ptr.vmem [resolvable:$false] %s2514_s11 }
  0x31   : > { %1191 = vmatmul.mubr.bf16.vlgmr.msra.gmra.mrb[0].mxu1 %v2417_v34  ;;  %1037 = vmatprep.mubr.bf16.mxu0 %v2420_v36  ;;  %s2510_s9 = scalar_lea.vmem %s2942_s5, 2048  ;;  %s2516_s12 = scalar_lea.vmem %s2515_s11, 4096 }
  0x32   : > { %1198 = vmatprep.mubr.bf16.mxu1 %v2422_v37  ;;  %p2511_p12 = scmp.ne.s32.totalorder %s2942_s5, %s2510_s9  ;;  %p2517_p1 = scmp.lt.s32.totalorder %s2942_s5, %s2515_s11 }
  0x33   : > { %p2518_p2 = scmp.lt.s32.totalorder %s2516_s12, %s2510_s9 }
  0x34   : > { %p2512_p13 = pnand %p2511_p12, %p2658_p4 }
  0x35   : > { %p2519_p3 = por %p2518_p2, %p2517_p1 }
  0x36   : > { %p2513_p0 = pneg %p2512_p13 }
  0x38   : > { %1038 = vmatmul.mubr.bf16.gmra.mrb[4].mxu0 %v2424_v38  ;;  %p2520_p5 = pnand %p2519_p3, %p2513_p0 }
  0x39   : > { %1199 = vmatmul.mubr.bf16.gmra.mrb[4].mxu1 %v2425_v39  ;;  %1045 = vmatprep.mubr.bf16.mxu0 %v2426_v40 }
  0x3a   : > { %1206 = vmatprep.mubr.bf16.mxu1 %v2428_v41  ;;  %v1578_v41 = vld [vmem:[%s2846_s13] sm:$0xff] }
  0x40   : > { %1046 = vmatmul.mubr.bf16.gmra.mrb[8].mxu0 %v2430_v42 }
  0x41   : > { %1207 = vmatmul.mubr.bf16.gmra.mrb[8].mxu1 %v2431_v43  ;;  %1053 = vmatprep.mubr.bf16.mxu0 %v2432_v44 }
  0x42   : > { %1214 = vmatprep.mubr.bf16.mxu1 %v2434_v45 }
  0x48   : > { %1054 = vmatmul.mubr.bf16.gmra.mrb[12].mxu0 %v2436_v46  ;;  %v1579_v46 = vld [vmem:[%s2846_s13 + $0x8] sm:$0xff] }
  0x49   : > { %1215 = vmatmul.mubr.bf16.gmra.mrb[12].mxu1 %v2437_v47  ;;  %1061 = vmatprep.mubr.bf16.mxu0 %v2438_v48 }
  0x4a   : > { %1222 = vmatprep.mubr.bf16.mxu1 %v2440_v49 }
  0x50   : > { %1062 = vmatmul.mubr.bf16.gmra.mrb[16].mxu0 %v2442_v50 }
  0x51   : > { %1223 = vmatmul.mubr.bf16.gmra.mrb[16].mxu1 %v2443_v51  ;;  %1069 = vmatprep.mubr.bf16.mxu0 %v2444_v52 }
  0x52   : > { %1230 = vmatprep.mubr.bf16.mxu1 %v2446_v53 }
  0x58   : > { %1070 = vmatmul.mubr.bf16.gmra.mrb[20].mxu0 %v2448_v54 }
  0x59   : > { %1231 = vmatmul.mubr.bf16.gmra.mrb[20].mxu1 %v2449_v55  ;;  %1077 = vmatprep.mubr.bf16.mxu0 %v2450_v56 }
  0x5a   : > { %1238 = vmatprep.mubr.bf16.mxu1 %v2452_v57 }
  0x60   : > { %1078 = vmatmul.mubr.bf16.gmra.mrb[24].mxu0 %v2454_v58 }
  0x61   : > { %1239 = vmatmul.mubr.bf16.gmra.mrb[24].mxu1 %v2455_v59  ;;  %1085 = vmatprep.mubr.bf16.mxu0 %v2456_v60  ;;  %v1580_v60 = vld [vmem:[%s2846_s13 + $0x10] sm:$0xff] }
  0x62   : > { %1246 = vmatprep.mubr.bf16.mxu1 %v2458_v61 }
  0x68   : > { %1086 = vmatmul.mubr.bf16.gmra.mrb[28].mxu0 %v2460_v62 }
  0x69   : > { %1247 = vmatmul.mubr.bf16.gmra.mrb[28].mxu1 %v2461_v63  ;;  %1093 = vmatprep.mubr.bf16.mxu0 %v2462_v0 }
  0x6a   : > { %1254 = vmatprep.mubr.bf16.mxu1 %v2464_v1  ;;  %v1581_v1 = vld [vmem:[%s2846_s13 + $0x18] sm:$0xff] }
  0x70   : > { %1094 = vmatmul.mubr.bf16.gmra.mrb[32].mxu0 %v2466_v2 }
  0x71   : > { %1255 = vmatmul.mubr.bf16.gmra.mrb[32].mxu1 %v2467_v3  ;;  %1101 = vmatprep.mubr.bf16.mxu0 %v2468_v4 }
  0x72   : > { %1262 = vmatprep.mubr.bf16.mxu1 %v2470_v5 }
  0x78   : > { %1102 = vmatmul.mubr.bf16.gmra.mrb[36].mxu0 %v2472_v6 }
  0x79   : > { %1263 = vmatmul.mubr.bf16.gmra.mrb[36].mxu1 %v2473_v7  ;;  %1109 = vmatprep.mubr.bf16.mxu0 %v2474_v8 }
  0x7a   : > { %1270 = vmatprep.mubr.bf16.mxu1 %v2476_v9 }
  0x80   : > { %1110 = vmatmul.mubr.bf16.gmra.mrb[40].mxu0 %v2478_v10 }
  0x81   : > { %1271 = vmatmul.mubr.bf16.gmra.mrb[40].mxu1 %v2479_v11  ;;  %1117 = vmatprep.mubr.bf16.mxu0 %v2480_v12 }
  0x82   : > { %1278 = vmatprep.mubr.bf16.mxu1 %v2482_v13 }
  0x88   : > { %1118 = vmatmul.mubr.bf16.gmra.mrb[44].mxu0 %v2484_v14 }
  0x89   : > { %1279 = vmatmul.mubr.bf16.gmra.mrb[44].mxu1 %v2485_v15  ;;  %1125 = vmatprep.mubr.bf16.mxu0 %v2486_v16  ;;  %v1582_v15 = vld [vmem:[%s2846_s13 + $0x20] sm:$0xff] }
  0x8a   : > { %1286 = vmatprep.mubr.bf16.mxu1 %v2488_v17 }
  0x90   : > { %1126 = vmatmul.mubr.bf16.gmra.mrb[48].mxu0 %v2490_v18 }
  0x91   : > { %1287 = vmatmul.mubr.bf16.gmra.mrb[48].mxu1 %v2491_v19  ;;  %1133 = vmatprep.mubr.bf16.mxu0 %v2492_v20  ;;  %v1583_v20 = vld [vmem:[%s2846_s13 + $0x28] sm:$0xff] }
  0x92   : > { %1294 = vmatprep.mubr.bf16.mxu1 %v2494_v21 }
  0x98   : > { %1134 = vmatmul.mubr.bf16.gmra.mrb[52].mxu0 %v2496_v22 }
  0x99   : > { %1295 = vmatmul.mubr.bf16.gmra.mrb[52].mxu1 %v2497_v23  ;;  %1141 = vmatprep.mubr.bf16.mxu0 %v2498_v24 }
  0x9a   : > { %1302 = vmatprep.mubr.bf16.mxu1 %v2500_v25 }
  0xa0   : > { %1142 = vmatmul.mubr.bf16.gmra.mrb[56].mxu0 %v2502_v26 }
  0xa1   : > { %1303 = vmatmul.mubr.bf16.gmra.mrb[56].mxu1 %v2503_v27  ;;  %1149 = vmatprep.mubr.bf16.mxu0 %v2504_v28 }
  0xa2   : > { %1310 = vmatprep.mubr.bf16.mxu1 %v2506_v29 }
  0xa8   : > { %1150 = vmatmul.mubr.bf16.gmra.mrb[60].mxu0 %v2508_v30 }
  0xa9   : > { %1311 = vmatmul.mubr.bf16.gmra.mrb[60].mxu1 %v2509_v31 }
 0x103   : > { %v2117_v32 = vpop.f32.mrb[0].mxu0 }
 0x104   : > { %v2229_v33 = vpop.f32.mrb[0].mxu1  ;;  %v2118_v34 = vpop.f32.mrb[1].mxu0 }
 0x105   : > { %v2119_v35 = vadd.f32 %v2118_v34, %v2117_v32  ;;  %v2230_v36 = vpop.f32.mrb[1].mxu1  ;;  %v2120_v37 = vpop.f32.mrb[2].mxu0  ;;  %v1584_v34 = vld [vmem:[%s2846_s13 + $0x30] sm:$0xff] }
 0x106   : > { %v2231_v38 = vadd.f32 %v2230_v36, %v2229_v33  ;;  %v2232_v39 = vpop.f32.mrb[2].mxu1  ;;  %v2121_v40 = vpop.f32.mrb[3].mxu0 }
 0x107   : > { %v2122_v42 = vadd.f32 %v2121_v40, %v2120_v37  ;;  %v2233_v43 = vpop.f32.mrb[3].mxu1 }
 0x108   : > { %v1193_v44 = vadd.f32 %v2231_v38, %v2119_v35  ;;  %v2234_v45 = vadd.f32 %v2233_v43, %v2232_v39  ;;  %v1585_v39 = vld [vmem:[%s2846_s13 + $0x38] sm:$0xff] }
 0x10a   : > { %v1610_v47 = vadd.f32 %v1578_v41, %v1193_v44  ;;  %v1196_v48 = vadd.f32 %v2234_v45, %v2122_v42 }
 0x10b   : > { %v2123_v49 = vpop.f32.mrb[4].mxu0 }
 0x10c   : > { %1642 = vst [vmem:[%s2855_s24] sm:$0xff] %v1610_v47  ;;  %v2009_v50 = vpack.c.bf16 %v1196_v48, %v1193_v44  ;;  %v1611_v51 = vadd.f32 %v1579_v46, %v1196_v48  ;;  %v2235_v52 = vpop.f32.mrb[4].mxu1  ;;  %v2124_v53 = vpop.f32.mrb[5].mxu0 }
 0x10d   : > { %v2125_v54 = vadd.f32 %v2124_v53, %v2123_v49  ;;  %v2236_v55 = vpop.f32.mrb[5].mxu1  ;;  %v2126_v56 = vpop.f32.mrb[6].mxu0  ;;  %v1586_v53 = vld [vmem:[%s2846_s13 + $0x40] sm:$0xff] }
 0x10e   : > { %2010 = vst [vmem:[%s2859_s26] sm:$0xff] %v2009_v50   ;;  %1643 = vst [vmem:[%s2855_s24 + $0x8] sm:$0xff] %v1611_v51  ;;  %v2237_v57 = vadd.f32 %v2236_v55, %v2235_v52  ;;  %v2238_v58 = vpop.f32.mrb[6].mxu1  ;;  %v2127_v59 = vpop.f32.mrb[7].mxu0 }
 0x10f   : > { %v2128_v61 = vadd.f32 %v2127_v59, %v2126_v56  ;;  %v2239_v62 = vpop.f32.mrb[7].mxu1 }
 0x110   : > { %v1201_v63 = vadd.f32 %v2237_v57, %v2125_v54  ;;  %v2240_v0 = vadd.f32 %v2239_v62, %v2238_v58  ;;  %v1587_v58 = vld [vmem:[%s2846_s13 + $0x48] sm:$0xff] }
 0x112   : > { %v1612_v2 = vadd.f32 %v1580_v60, %v1201_v63  ;;  %v1204_v3 = vadd.f32 %v2240_v0, %v2128_v61 }
 0x113   : > { %v2129_v4 = vpop.f32.mrb[8].mxu0 }
 0x114   : > { %1644 = vst [vmem:[%s2855_s24 + $0x10] sm:$0xff] %v1612_v2  ;;  %v2014_v5 = vpack.c.bf16 %v1204_v3, %v1201_v63  ;;  %v1613_v6 = vadd.f32 %v1581_v1, %v1204_v3  ;;  %v2241_v7 = vpop.f32.mrb[8].mxu1  ;;  %v2130_v8 = vpop.f32.mrb[9].mxu0 }
 0x115   : > { %v2131_v9 = vadd.f32 %v2130_v8, %v2129_v4  ;;  %v2242_v10 = vpop.f32.mrb[9].mxu1  ;;  %v2132_v11 = vpop.f32.mrb[10].mxu0  ;;  %v1588_v8 = vld [vmem:[%s2846_s13 + $0x50] sm:$0xff] }
 0x116   : > { %2086 = vst [vmem:[%s2859_s26 + $0x8] sm:$0xff] %v2014_v5   ;;  %1645 = vst [vmem:[%s2855_s24 + $0x18] sm:$0xff] %v1613_v6  ;;  %v2243_v12 = vadd.f32 %v2242_v10, %v2241_v7  ;;  %v2244_v13 = vpop.f32.mrb[10].mxu1  ;;  %v2133_v14 = vpop.f32.mrb[11].mxu0 }
 0x117   : > { %v2134_v16 = vadd.f32 %v2133_v14, %v2132_v11  ;;  %v2245_v17 = vpop.f32.mrb[11].mxu1 }
 0x118   : > { %v1209_v18 = vadd.f32 %v2243_v12, %v2131_v9  ;;  %v2246_v19 = vadd.f32 %v2245_v17, %v2244_v13  ;;  %v1589_v13 = vld [vmem:[%s2846_s13 + $0x58] sm:$0xff] }
 0x11a   : > { %v1614_v21 = vadd.f32 %v1582_v15, %v1209_v18  ;;  %v1212_v22 = vadd.f32 %v2246_v19, %v2134_v16 }
 0x11b   : > { %v2135_v23 = vpop.f32.mrb[12].mxu0 }
 0x11c   : > { %1646 = vst [vmem:[%s2855_s24 + $0x20] sm:$0xff] %v1614_v21  ;;  %v2019_v24 = vpack.c.bf16 %v1212_v22, %v1209_v18  ;;  %v1615_v25 = vadd.f32 %v1583_v20, %v1212_v22  ;;  %v2247_v26 = vpop.f32.mrb[12].mxu1  ;;  %v2136_v27 = vpop.f32.mrb[13].mxu0 }
 0x11d   : > { %v2137_v28 = vadd.f32 %v2136_v27, %v2135_v23  ;;  %v2248_v29 = vpop.f32.mrb[13].mxu1  ;;  %v2138_v30 = vpop.f32.mrb[14].mxu0  ;;  %v1590_v27 = vld [vmem:[%s2846_s13 + $0x60] sm:$0xff] }
 0x11e   : > { %2087 = vst [vmem:[%s2859_s26 + $0x10] sm:$0xff] %v2019_v24   ;;  %1647 = vst [vmem:[%s2855_s24 + $0x28] sm:$0xff] %v1615_v25  ;;  %v2249_v31 = vadd.f32 %v2248_v29, %v2247_v26  ;;  %v2250_v32 = vpop.f32.mrb[14].mxu1  ;;  %v2139_v33 = vpop.f32.mrb[15].mxu0 }
 0x11f   : > { %v2140_v35 = vadd.f32 %v2139_v33, %v2138_v30  ;;  %v2251_v36 = vpop.f32.mrb[15].mxu1 }
 0x120   : > { %v1217_v37 = vadd.f32 %v2249_v31, %v2137_v28  ;;  %v2252_v38 = vadd.f32 %v2251_v36, %v2250_v32  ;;  %v1591_v32 = vld [vmem:[%s2846_s13 + $0x68] sm:$0xff] }
 0x122   : > { %v1616_v40 = vadd.f32 %v1584_v34, %v1217_v37  ;;  %v1220_v41 = vadd.f32 %v2252_v38, %v2140_v35 }
 0x123   : > { %v2141_v42 = vpop.f32.mrb[16].mxu0 }
 0x124   : > { %1648 = vst [vmem:[%s2855_s24 + $0x30] sm:$0xff] %v1616_v40  ;;  %v2024_v43 = vpack.c.bf16 %v1220_v41, %v1217_v37  ;;  %v1617_v44 = vadd.f32 %v1585_v39, %v1220_v41  ;;  %v2253_v45 = vpop.f32.mrb[16].mxu1  ;;  %v2142_v46 = vpop.f32.mrb[17].mxu0 }
 0x125   : > { %v2143_v47 = vadd.f32 %v2142_v46, %v2141_v42  ;;  %v2254_v48 = vpop.f32.mrb[17].mxu1  ;;  %v2144_v49 = vpop.f32.mrb[18].mxu0  ;;  %v1592_v46 = vld [vmem:[%s2846_s13 + $0x70] sm:$0xff] }
 0x126   : > { %2088 = vst [vmem:[%s2859_s26 + $0x18] sm:$0xff] %v2024_v43   ;;  %1649 = vst [vmem:[%s2855_s24 + $0x38] sm:$0xff] %v1617_v44  ;;  %v2255_v50 = vadd.f32 %v2254_v48, %v2253_v45  ;;  %v2256_v51 = vpop.f32.mrb[18].mxu1  ;;  %v2145_v52 = vpop.f32.mrb[19].mxu0 }
 0x127   : > { %v2146_v54 = vadd.f32 %v2145_v52, %v2144_v49  ;;  %v2257_v55 = vpop.f32.mrb[19].mxu1 }
 0x128   : > { %v1225_v56 = vadd.f32 %v2255_v50, %v2143_v47  ;;  %v2258_v57 = vadd.f32 %v2257_v55, %v2256_v51  ;;  %v1593_v51 = vld [vmem:[%s2846_s13 + $0x78] sm:$0xff] }
 0x12a   : > { %v1618_v59 = vadd.f32 %v1586_v53, %v1225_v56  ;;  %v1228_v60 = vadd.f32 %v2258_v57, %v2146_v54 }
 0x12b   : > { %v2147_v61 = vpop.f32.mrb[20].mxu0 }
 0x12c   : > { %1650 = vst [vmem:[%s2855_s24 + $0x40] sm:$0xff] %v1618_v59  ;;  %v2029_v62 = vpack.c.bf16 %v1228_v60, %v1225_v56  ;;  %v1619_v63 = vadd.f32 %v1587_v58, %v1228_v60  ;;  %v2259_v0 = vpop.f32.mrb[20].mxu1  ;;  %v2148_v1 = vpop.f32.mrb[21].mxu0 }
 0x12d   : > { %v2149_v2 = vadd.f32 %v2148_v1, %v2147_v61  ;;  %v2260_v3 = vpop.f32.mrb[21].mxu1  ;;  %v2150_v4 = vpop.f32.mrb[22].mxu0  ;;  %v1594_v1 = vld [vmem:[%s2846_s13 + $0x80] sm:$0xff] }
 0x12e   : > { %2089 = vst [vmem:[%s2859_s26 + $0x20] sm:$0xff] %v2029_v62   ;;  %1651 = vst [vmem:[%s2855_s24 + $0x48] sm:$0xff] %v1619_v63  ;;  %v2261_v5 = vadd.f32 %v2260_v3, %v2259_v0  ;;  %v2262_v6 = vpop.f32.mrb[22].mxu1  ;;  %v2151_v7 = vpop.f32.mrb[23].mxu0 }
 0x12f   : > { %v2152_v9 = vadd.f32 %v2151_v7, %v2150_v4  ;;  %v2263_v10 = vpop.f32.mrb[23].mxu1 }
 0x130   : > { %v1233_v11 = vadd.f32 %v2261_v5, %v2149_v2  ;;  %v2264_v12 = vadd.f32 %v2263_v10, %v2262_v6  ;;  %v1595_v6 = vld [vmem:[%s2846_s13 + $0x88] sm:$0xff] }
 0x132   : > { %v1620_v14 = vadd.f32 %v1588_v8, %v1233_v11  ;;  %v1236_v15 = vadd.f32 %v2264_v12, %v2152_v9 }
 0x133   : > { %v2153_v16 = vpop.f32.mrb[24].mxu0 }
 0x134   : > { %1652 = vst [vmem:[%s2855_s24 + $0x50] sm:$0xff] %v1620_v14  ;;  %v2034_v17 = vpack.c.bf16 %v1236_v15, %v1233_v11  ;;  %v1621_v18 = vadd.f32 %v1589_v13, %v1236_v15  ;;  %v2265_v19 = vpop.f32.mrb[24].mxu1  ;;  %v2154_v20 = vpop.f32.mrb[25].mxu0 }
 0x135   : > { %v2155_v21 = vadd.f32 %v2154_v20, %v2153_v16  ;;  %v2266_v22 = vpop.f32.mrb[25].mxu1  ;;  %v2156_v23 = vpop.f32.mrb[26].mxu0  ;;  %v1596_v20 = vld [vmem:[%s2846_s13 + $0x90] sm:$0xff] }
 0x136   : > { %2090 = vst [vmem:[%s2859_s26 + $0x28] sm:$0xff] %v2034_v17   ;;  %1653 = vst [vmem:[%s2855_s24 + $0x58] sm:$0xff] %v1621_v18  ;;  %v2267_v24 = vadd.f32 %v2266_v22, %v2265_v19  ;;  %v2268_v25 = vpop.f32.mrb[26].mxu1  ;;  %v2157_v26 = vpop.f32.mrb[27].mxu0 }
 0x137   : > { %v2158_v28 = vadd.f32 %v2157_v26, %v2156_v23  ;;  %v2269_v29 = vpop.f32.mrb[27].mxu1 }
 0x138   : > { %v1241_v30 = vadd.f32 %v2267_v24, %v2155_v21  ;;  %v2270_v31 = vadd.f32 %v2269_v29, %v2268_v25  ;;  %v1597_v25 = vld [vmem:[%s2846_s13 + $0x98] sm:$0xff] }
 0x13a   : > { %v1622_v33 = vadd.f32 %v1590_v27, %v1241_v30  ;;  %v1244_v34 = vadd.f32 %v2270_v31, %v2158_v28 }
 0x13b   : > { %v2159_v35 = vpop.f32.mrb[28].mxu0 }
 0x13c   : > { %1654 = vst [vmem:[%s2855_s24 + $0x60] sm:$0xff] %v1622_v33  ;;  %v2039_v36 = vpack.c.bf16 %v1244_v34, %v1241_v30  ;;  %v1623_v37 = vadd.f32 %v1591_v32, %v1244_v34  ;;  %v2271_v38 = vpop.f32.mrb[28].mxu1  ;;  %v2160_v39 = vpop.f32.mrb[29].mxu0 }
 0x13d   : > { %v2161_v40 = vadd.f32 %v2160_v39, %v2159_v35  ;;  %v2272_v41 = vpop.f32.mrb[29].mxu1  ;;  %v2162_v42 = vpop.f32.mrb[30].mxu0  ;;  %v1598_v39 = vld [vmem:[%s2846_s13 + $0xa0] sm:$0xff] }
 0x13e   : > { %2091 = vst [vmem:[%s2859_s26 + $0x30] sm:$0xff] %v2039_v36   ;;  %1655 = vst [vmem:[%s2855_s24 + $0x68] sm:$0xff] %v1623_v37  ;;  %v2273_v43 = vadd.f32 %v2272_v41, %v2271_v38  ;;  %v2274_v44 = vpop.f32.mrb[30].mxu1  ;;  %v2163_v45 = vpop.f32.mrb[31].mxu0 }
 0x13f   : > { %v2164_v47 = vadd.f32 %v2163_v45, %v2162_v42  ;;  %v2275_v48 = vpop.f32.mrb[31].mxu1 }
 0x140   : > { %v1249_v49 = vadd.f32 %v2273_v43, %v2161_v40  ;;  %v2276_v50 = vadd.f32 %v2275_v48, %v2274_v44  ;;  %v1599_v44 = vld [vmem:[%s2846_s13 + $0xa8] sm:$0xff] }
 0x142   : > { %v1624_v52 = vadd.f32 %v1592_v46, %v1249_v49  ;;  %v1252_v53 = vadd.f32 %v2276_v50, %v2164_v47 }
 0x143   : > { %v2165_v54 = vpop.f32.mrb[32].mxu0 }
 0x144   : > { %1656 = vst [vmem:[%s2855_s24 + $0x70] sm:$0xff] %v1624_v52  ;;  %v2044_v55 = vpack.c.bf16 %v1252_v53, %v1249_v49  ;;  %v1625_v56 = vadd.f32 %v1593_v51, %v1252_v53  ;;  %v2277_v57 = vpop.f32.mrb[32].mxu1  ;;  %v2166_v58 = vpop.f32.mrb[33].mxu0 }
 0x145   : > { %v2167_v59 = vadd.f32 %v2166_v58, %v2165_v54  ;;  %v2278_v60 = vpop.f32.mrb[33].mxu1  ;;  %v2168_v61 = vpop.f32.mrb[34].mxu0  ;;  %v1600_v58 = vld [vmem:[%s2846_s13 + $0xb0] sm:$0xff] }
 0x146   : > { %2092 = vst [vmem:[%s2859_s26 + $0x38] sm:$0xff] %v2044_v55   ;;  %1657 = vst [vmem:[%s2855_s24 + $0x78] sm:$0xff] %v1625_v56  ;;  %v2279_v62 = vadd.f32 %v2278_v60, %v2277_v57  ;;  %v2280_v63 = vpop.f32.mrb[34].mxu1  ;;  %v2169_v0 = vpop.f32.mrb[35].mxu0 }
 0x147   : > { %v2170_v2 = vadd.f32 %v2169_v0, %v2168_v61  ;;  %v2281_v3 = vpop.f32.mrb[35].mxu1 }
 0x148   : > { %v1257_v4 = vadd.f32 %v2279_v62, %v2167_v59  ;;  %v2282_v5 = vadd.f32 %v2281_v3, %v2280_v63  ;;  %v1601_v63 = vld [vmem:[%s2846_s13 + $0xb8] sm:$0xff] }
 0x14a   : > { %v1626_v7 = vadd.f32 %v1594_v1, %v1257_v4  ;;  %v1260_v8 = vadd.f32 %v2282_v5, %v2170_v2 }
 0x14b   : > { %v2171_v9 = vpop.f32.mrb[36].mxu0 }
 0x14c   : > { %1658 = vst [vmem:[%s2855_s24 + $0x80] sm:$0xff] %v1626_v7  ;;  %v2049_v10 = vpack.c.bf16 %v1260_v8, %v1257_v4  ;;  %v1627_v11 = vadd.f32 %v1595_v6, %v1260_v8  ;;  %v2283_v12 = vpop.f32.mrb[36].mxu1  ;;  %v2172_v13 = vpop.f32.mrb[37].mxu0 }
 0x14d   : > { %v2173_v14 = vadd.f32 %v2172_v13, %v2171_v9  ;;  %v2284_v15 = vpop.f32.mrb[37].mxu1  ;;  %v2174_v16 = vpop.f32.mrb[38].mxu0  ;;  %v1602_v13 = vld [vmem:[%s2846_s13 + $0xc0] sm:$0xff] }
 0x14e   : > { %2093 = vst [vmem:[%s2859_s26 + $0x40] sm:$0xff] %v2049_v10   ;;  %1659 = vst [vmem:[%s2855_s24 + $0x88] sm:$0xff] %v1627_v11  ;;  %v2285_v17 = vadd.f32 %v2284_v15, %v2283_v12  ;;  %v2286_v18 = vpop.f32.mrb[38].mxu1  ;;  %v2175_v19 = vpop.f32.mrb[39].mxu0 }
 0x14f   : > { %v2176_v21 = vadd.f32 %v2175_v19, %v2174_v16  ;;  %v2287_v22 = vpop.f32.mrb[39].mxu1 }
 0x150   : > { %v1265_v23 = vadd.f32 %v2285_v17, %v2173_v14  ;;  %v2288_v24 = vadd.f32 %v2287_v22, %v2286_v18  ;;  %v1603_v18 = vld [vmem:[%s2846_s13 + $0xc8] sm:$0xff] }
 0x152   : > { %v1628_v26 = vadd.f32 %v1596_v20, %v1265_v23  ;;  %v1268_v27 = vadd.f32 %v2288_v24, %v2176_v21 }
 0x153   : > { %v2177_v28 = vpop.f32.mrb[40].mxu0 }
 0x154   : > { %1660 = vst [vmem:[%s2855_s24 + $0x90] sm:$0xff] %v1628_v26  ;;  %v2054_v29 = vpack.c.bf16 %v1268_v27, %v1265_v23  ;;  %v1629_v30 = vadd.f32 %v1597_v25, %v1268_v27  ;;  %v2289_v31 = vpop.f32.mrb[40].mxu1  ;;  %v2178_v32 = vpop.f32.mrb[41].mxu0 }
 0x155   : > { %v2179_v33 = vadd.f32 %v2178_v32, %v2177_v28  ;;  %v2290_v34 = vpop.f32.mrb[41].mxu1  ;;  %v2180_v35 = vpop.f32.mrb[42].mxu0  ;;  %v1604_v32 = vld [vmem:[%s2846_s13 + $0xd0] sm:$0xff] }
 0x156   : > { %2094 = vst [vmem:[%s2859_s26 + $0x48] sm:$0xff] %v2054_v29   ;;  %1661 = vst [vmem:[%s2855_s24 + $0x98] sm:$0xff] %v1629_v30  ;;  %v2291_v36 = vadd.f32 %v2290_v34, %v2289_v31  ;;  %v2292_v37 = vpop.f32.mrb[42].mxu1  ;;  %v2181_v38 = vpop.f32.mrb[43].mxu0 }
 0x157   : > { %v2182_v40 = vadd.f32 %v2181_v38, %v2180_v35  ;;  %v2293_v41 = vpop.f32.mrb[43].mxu1 }
 0x158   : > { %v1273_v42 = vadd.f32 %v2291_v36, %v2179_v33  ;;  %v2294_v43 = vadd.f32 %v2293_v41, %v2292_v37  ;;  %v1605_v37 = vld [vmem:[%s2846_s13 + $0xd8] sm:$0xff] }
 0x15a   : > { %v1630_v45 = vadd.f32 %v1598_v39, %v1273_v42  ;;  %v1276_v46 = vadd.f32 %v2294_v43, %v2182_v40 }
 0x15b   : > { %v2183_v47 = vpop.f32.mrb[44].mxu0 }
 0x15c   : > { %1662 = vst [vmem:[%s2855_s24 + $0xa0] sm:$0xff] %v1630_v45  ;;  %v2059_v48 = vpack.c.bf16 %v1276_v46, %v1273_v42  ;;  %v1631_v49 = vadd.f32 %v1599_v44, %v1276_v46  ;;  %v2295_v50 = vpop.f32.mrb[44].mxu1  ;;  %v2184_v51 = vpop.f32.mrb[45].mxu0 }
 0x15d   : > { %v2185_v52 = vadd.f32 %v2184_v51, %v2183_v47  ;;  %v2296_v53 = vpop.f32.mrb[45].mxu1  ;;  %v2186_v54 = vpop.f32.mrb[46].mxu0  ;;  %v1606_v51 = vld [vmem:[%s2846_s13 + $0xe0] sm:$0xff] }
 0x15e   : > { %2095 = vst [vmem:[%s2859_s26 + $0x50] sm:$0xff] %v2059_v48   ;;  %1663 = vst [vmem:[%s2855_s24 + $0xa8] sm:$0xff] %v1631_v49  ;;  %v2297_v55 = vadd.f32 %v2296_v53, %v2295_v50  ;;  %v2298_v56 = vpop.f32.mrb[46].mxu1  ;;  %v2187_v57 = vpop.f32.mrb[47].mxu0 }
 0x15f   : > { %v2188_v59 = vadd.f32 %v2187_v57, %v2186_v54  ;;  %v2299_v60 = vpop.f32.mrb[47].mxu1 }
 0x160   : > { %v1281_v61 = vadd.f32 %v2297_v55, %v2185_v52  ;;  %v2300_v62 = vadd.f32 %v2299_v60, %v2298_v56  ;;  %v1607_v56 = vld [vmem:[%s2846_s13 + $0xe8] sm:$0xff] }
 0x162   : > { %v1632_v0 = vadd.f32 %v1600_v58, %v1281_v61  ;;  %v1284_v1 = vadd.f32 %v2300_v62, %v2188_v59 }
 0x163   : > { %v2189_v2 = vpop.f32.mrb[48].mxu0 }
 0x164   : > { %1664 = vst [vmem:[%s2855_s24 + $0xb0] sm:$0xff] %v1632_v0  ;;  %v2064_v3 = vpack.c.bf16 %v1284_v1, %v1281_v61  ;;  %v1633_v4 = vadd.f32 %v1601_v63, %v1284_v1  ;;  %v2301_v5 = vpop.f32.mrb[48].mxu1  ;;  %v2190_v6 = vpop.f32.mrb[49].mxu0 }
 0x165   : > { %v2191_v7 = vadd.f32 %v2190_v6, %v2189_v2  ;;  %v2302_v8 = vpop.f32.mrb[49].mxu1  ;;  %v2192_v9 = vpop.f32.mrb[50].mxu0  ;;  %v1608_v6 = vld [vmem:[%s2846_s13 + $0xf0] sm:$0xff] }
 0x166   : > { %2096 = vst [vmem:[%s2859_s26 + $0x58] sm:$0xff] %v2064_v3   ;;  %1665 = vst [vmem:[%s2855_s24 + $0xb8] sm:$0xff] %v1633_v4  ;;  %v2303_v10 = vadd.f32 %v2302_v8, %v2301_v5  ;;  %v2304_v11 = vpop.f32.mrb[50].mxu1  ;;  %v2193_v12 = vpop.f32.mrb[51].mxu0 }
 0x167   : > { %v2194_v14 = vadd.f32 %v2193_v12, %v2192_v9  ;;  %v2305_v15 = vpop.f32.mrb[51].mxu1 }
 0x168   : > { %v1289_v16 = vadd.f32 %v2303_v10, %v2191_v7  ;;  %v2306_v17 = vadd.f32 %v2305_v15, %v2304_v11  ;;  %v1609_v11 = vld [vmem:[%s2846_s13 + $0xf8] sm:$0xff] }
 0x16a   : > { %v1634_v19 = vadd.f32 %v1602_v13, %v1289_v16  ;;  %v1292_v20 = vadd.f32 %v2306_v17, %v2194_v14 }
 0x16b   : > { %v2195_v21 = vpop.f32.mrb[52].mxu0 }
 0x16c   : > { %1666 = vst [vmem:[%s2855_s24 + $0xc0] sm:$0xff] %v1634_v19  ;;  %v2069_v22 = vpack.c.bf16 %v1292_v20, %v1289_v16  ;;  %v1635_v23 = vadd.f32 %v1603_v18, %v1292_v20  ;;  %v2307_v24 = vpop.f32.mrb[52].mxu1  ;;  %v2196_v25 = vpop.f32.mrb[53].mxu0 }
 0x16d   : > { %v2197_v26 = vadd.f32 %v2196_v25, %v2195_v21  ;;  %v2308_v27 = vpop.f32.mrb[53].mxu1  ;;  %v2198_v28 = vpop.f32.mrb[54].mxu0 }
 0x16e   : > { %2097 = vst [vmem:[%s2859_s26 + $0x60] sm:$0xff] %v2069_v22   ;;  %1667 = vst [vmem:[%s2855_s24 + $0xc8] sm:$0xff] %v1635_v23  ;;  %v2309_v29 = vadd.f32 %v2308_v27, %v2307_v24  ;;  %v2310_v30 = vpop.f32.mrb[54].mxu1  ;;  %v2199_v31 = vpop.f32.mrb[55].mxu0 }
 0x16f   : > { %v2200_v33 = vadd.f32 %v2199_v31, %v2198_v28  ;;  %v2311_v34 = vpop.f32.mrb[55].mxu1 }
 0x170   : > { %v1297_v35 = vadd.f32 %v2309_v29, %v2197_v26  ;;  %v2312_v36 = vadd.f32 %v2311_v34, %v2310_v30 }
 0x172   : > { %v1636_v38 = vadd.f32 %v1604_v32, %v1297_v35  ;;  %v1300_v39 = vadd.f32 %v2312_v36, %v2200_v33 }
 0x173   : > { %v2201_v40 = vpop.f32.mrb[56].mxu0 }
 0x174   : > { %1668 = vst [vmem:[%s2855_s24 + $0xd0] sm:$0xff] %v1636_v38  ;;  %v2074_v41 = vpack.c.bf16 %v1300_v39, %v1297_v35  ;;  %v1637_v42 = vadd.f32 %v1605_v37, %v1300_v39  ;;  %v2313_v43 = vpop.f32.mrb[56].mxu1  ;;  %v2202_v44 = vpop.f32.mrb[57].mxu0 }
 0x175   : > { %v2203_v45 = vadd.f32 %v2202_v44, %v2201_v40  ;;  %v2314_v46 = vpop.f32.mrb[57].mxu1  ;;  %v2204_v47 = vpop.f32.mrb[58].mxu0 }
 0x176   : > { %2098 = vst [vmem:[%s2859_s26 + $0x68] sm:$0xff] %v2074_v41   ;;  %1669 = vst [vmem:[%s2855_s24 + $0xd8] sm:$0xff] %v1637_v42  ;;  %v2315_v48 = vadd.f32 %v2314_v46, %v2313_v43  ;;  %v2316_v49 = vpop.f32.mrb[58].mxu1  ;;  %v2205_v50 = vpop.f32.mrb[59].mxu0 }
 0x177   : > { %v2206_v52 = vadd.f32 %v2205_v50, %v2204_v47  ;;  %v2317_v53 = vpop.f32.mrb[59].mxu1 }
 0x178   : > { %v1305_v54 = vadd.f32 %v2315_v48, %v2203_v45  ;;  %v2318_v55 = vadd.f32 %v2317_v53, %v2316_v49 }
 0x17a   : > { %v1638_v57 = vadd.f32 %v1606_v51, %v1305_v54  ;;  %v1308_v58 = vadd.f32 %v2318_v55, %v2206_v52 }
 0x17b   : > { %v2207_v59 = vpop.f32.mrb[60].mxu0 }
 0x17c   : > { %1670 = vst [vmem:[%s2855_s24 + $0xe0] sm:$0xff] %v1638_v57  ;;  %v2079_v60 = vpack.c.bf16 %v1308_v58, %v1305_v54  ;;  %v1639_v61 = vadd.f32 %v1607_v56, %v1308_v58  ;;  %v2319_v62 = vpop.f32.mrb[60].mxu1  ;;  %v2208_v63 = vpop.f32.mrb[61].mxu0 }
 0x17d   : > { %v2209_v0 = vadd.f32 %v2208_v63, %v2207_v59  ;;  %v2320_v1 = vpop.f32.mrb[61].mxu1  ;;  %v2210_v2 = vpop.f32.mrb[62].mxu0 }
 0x17e   : > { %2099 = vst [vmem:[%s2859_s26 + $0x70] sm:$0xff] %v2079_v60   ;;  %1671 = vst [vmem:[%s2855_s24 + $0xe8] sm:$0xff] %v1639_v61  ;;  %v2321_v3 = vadd.f32 %v2320_v1, %v2319_v62  ;;  %v2322_v4 = vpop.f32.mrb[62].mxu1  ;;  %v2211_v5 = vpop.f32.mrb[63].mxu0 }
 0x17f   : > { %v2212_v7 = vadd.f32 %v2211_v5, %v2210_v2  ;;  %v2323_v8 = vpop.f32.mrb[63].mxu1 }
 0x180   : > { %v1313_v9 = vadd.f32 %v2321_v3, %v2209_v0  ;;  %v2324_v10 = vadd.f32 %v2323_v8, %v2322_v4 }
 0x182   : > { %v1640_v12 = vadd.f32 %v1608_v6, %v1313_v9  ;;  %v1316_v13 = vadd.f32 %v2324_v10, %v2212_v7 }
 0x184   : > { %1672 = vst [vmem:[%s2855_s24 + $0xf0] sm:$0xff] %v1640_v12  ;;  %v2084_v14 = vpack.c.bf16 %v1316_v13, %v1313_v9  ;;  %v1641_v15 = vadd.f32 %v1609_v11, %v1316_v13 }
 0x186   : > { %2100 = vst [vmem:[%s2859_s26 + $0x78] sm:$0xff] %v2084_v14   ;;  %1673 = vst [vmem:[%s2855_s24 + $0xf8] sm:$0xff] %v1641_v15 }
 0x187   : > { %2523 = shalt.err (!%p2520_p5)
}
 0x188   : > { %s2524_s13 = scalar_lea.hbm %s2940_s8, 2048  ;;  %s2528_s21 = scalar_lea.hbm %s2998_s3, 4096 }
 0x189   : > { %p2525_p6 = scmp.ne.s32.totalorder %s2940_s8, %s2524_s13  ;;  %p2529_p10 = scmp.lt.u32.totalorder %s2940_s8, %s2998_s3 }
 0x18a   : > { %p2530_p11 = scmp.lt.u32.totalorder %s2528_s21, %s2524_s13  ;;  %p2532_p13 = scmp.lt.u32.totalorder %s2524_s13, %s2940_s8 }
 0x18b   : > { %p2526_p7 = pnand %p2525_p6, %p2658_p4 }
 0x18c   : > { %p2531_p12 = por %p2530_p11, %p2529_p10 }
 0x18d   : > { %p2527_p9 = pneg %p2526_p7 }
 0x18e   : > { %p2533_p0 = por %p2532_p13, %p2531_p12 }
 0x190   : > { %p2534_p1 = pnand %p2533_p0, %p2527_p9 }
 0x192   : > { %2537 = shalt.err (!%p2534_p1)
}
 0x193   : > { %s2591_s26 = smov 64   ;;  %s2592_s30 = smov 4  }
 0x194   : > { %2325 = dma.vmem_to_hbm [thread:$0]  (%p2658_p4), %s2942_s5, 2048, %s2940_s8, %s2949_s18, %s2591_s26, %s2591_s26, %s2592_s30  }
 0x195 PF: > { %p2331_p2 = scmp.ge.s32.totalorder %s2588_s20, 2  ;;  %s1712_s6 = sand.u32 1, %s2568_s15  }
 0x196   : > { %s1713_s7 = scalar_lea.sflag [#allocation4], %s1712_s6 }
 0x197   : > { %p2328_p3 = pnand %p2331_p2, %p2665_p8 }
 0x199   : > { %2563 = dma.done.wait (!%p2328_p3), %s1713_s7, 2048  }
 0x19a   : > { %2565 = vsyncadd (!%p2328_p3), %s1713_s7, 4294965248  ;;  %s18_s20 = sadd.s32 1, %s2588_s20   ;;  %s3002_s15 = smov %s2572_s16 }
 0x19b   : > { %p15_p5 = scmp.ge.s32.totalorder %s18_s20, 4   ;;  %s3003_s16 = smov %s2576_s17 }
 0x19c   : > { %s3004_s17 = smov %s2671_s28  ;;  %s3005_s18 = smov %s2584_s19 }
 0x19d   : > { %s3006_s19 = smov %s3008_s23  ;;  %17 = sbr.rel (!%p15_p5) target bundleno = 4 (0x4), region = 93 }
 0x1a4   :  { %1726 = vsyncpa [#allocation4], 1 }
 0x1a5   :  { %1728 = vsyncpa [#allocation4 + $0x1], 1 }

// kernel: lightgcn_forward.3
= control target key start
LH: loop header
LB: loop body
LE: loop exit
PB: predicated region body
PF: predicated region fallthrough
CT: control target
= control target key end

     0   :  { %s2506_s15 = smov 0   ;;  %s2508_s16 = smov 0   ;;  %s2801_s0 = inlined_call_operand.vmem [shape: bf16[512,512], index: 0, kind: input, shape index: {}]   ;;  %s2802_s1 = inlined_call_operand.vmem [shape: bf16[512,128], index: 1, kind: input, shape index: {}]   ;;  %s2803_s2 = inlined_call_operand.vmem [shape: f32[512,128], index: 2, kind: input, shape index: {}]   ;;  %s2804_s3 = inlined_call_operand.vmem [shape: bf16[512,128], index: 3, kind: output, shape index: {0}]   ;;  %s2805_s4 = inlined_call_operand.vmem [shape: f32[512,128], index: 4, kind: output, shape index: {1}]  }
   0x1   :  { %s2510_s17 = smov 0  }
   0x2 LB: > { %s27_s18 = sadd.s32 1, %s2475_s16  ;;  %p1813_p0 = scmp.ge.s32.totalorder %s2479_s17, 1  ;;  %s2479_s17 = sphi %s2510_s17, %s15_s17   ;;  %s2475_s16 = sphi %s2508_s16, %s2807_s16   ;;  %s2471_s15 = sphi %s2506_s15, %s2806_s15  }
   0x3   : > { %p29_p1 = scmp.ge.s32.totalorder %s27_s18, 2  ;;  %p208_p2 = scmp.lt.s32.totalorder %s2479_s17, 3 }
   0x5   : > { %s2809_s18 = smov (%p29_p1, %s27_s18), 0  ;;  %p209_p3 = pnand %p1813_p0, %p208_p2 }
   0x6   : > { %v2329_v0 = vld [vmem:[%s2802_s1 + $0x40] sm:$0xff] (!%p209_p3)   ;;  %v2333_v4 = vld [vmem:[%s2802_s1 + $0x48] sm:$0xff] (!%p209_p3)   ;;  %v2337_v8 = vld [vmem:[%s2802_s1 + $0x50] sm:$0xff] (!%p209_p3)   ;;  %s1814_s29 = sshll.u32 (!%p209_p3), %s2471_s15, 5 }
   0x7   : > { %212 = sbr.rel (%p209_p3) target bundleno = 383 (0x17f), region = 32  ;;  %v2330_v1 = vld [vmem:[%s2802_s1 + $0xc0] sm:$0xff] (!%p209_p3)   ;;  %2081 = vmatprep.subr.bf16.mxu0 (!%p209_p3), %v2329_v0  ;;  %v2334_v5 = vld [vmem:[%s2802_s1 + $0xc8] sm:$0xff] (!%p209_p3)   ;;  %v2338_v9 = vld [vmem:[%s2802_s1 + $0xd0] sm:$0xff] (!%p209_p3)   ;;  %p256_p4 = scmp.lt.s32.totalorder (!%p209_p3), %s1814_s29, 63 }
   0x8   : > { %v2331_v2 = vld [vmem:[%s2802_s1] sm:$0xff] (!%p209_p3)   ;;  %2193 = vmatprep.subr.bf16.mxu1 (!%p209_p3), %v2330_v1  ;;  %v2335_v6 = vld [vmem:[%s2802_s1 + $0x8] sm:$0xff] (!%p209_p3)   ;;  %v2339_v10 = vld [vmem:[%s2802_s1 + $0x10] sm:$0xff] (!%p209_p3)  }
   0x9   : > { %v2332_v3 = vld [vmem:[%s2802_s1 + $0x80] sm:$0xff] (!%p209_p3)   ;;  %2082 = vmatpush3.bf16.msra.mxu0 (!%p209_p3), %v2331_v2  ;;  %v2336_v7 = vld [vmem:[%s2802_s1 + $0x88] sm:$0xff] (!%p209_p3)   ;;  %v2340_v11 = vld [vmem:[%s2802_s1 + $0x90] sm:$0xff] (!%p209_p3)  }
   0xa   : > { %2194 = vmatpush3.bf16.msra.mxu1 (!%p209_p3), %v2332_v3  ;;  %2083 = vmatprep.subr.bf16.mxu0 (!%p209_p3), %v2333_v4  ;;  %v2341_v12 = vld [vmem:[%s2802_s1 + $0x58] sm:$0xff] (!%p209_p3)   ;;  %v2345_v16 = vld [vmem:[%s2802_s1 + $0x60] sm:$0xff] (!%p209_p3)   ;;  %v2349_v20 = vld [vmem:[%s2802_s1 + $0x68] sm:$0xff] (!%p209_p3)  }
   0xb   : > { %2195 = vmatprep.subr.bf16.mxu1 (!%p209_p3), %v2334_v5  ;;  %v2342_v13 = vld [vmem:[%s2802_s1 + $0xd8] sm:$0xff] (!%p209_p3)   ;;  %v2346_v17 = vld [vmem:[%s2802_s1 + $0xe0] sm:$0xff] (!%p209_p3)   ;;  %v2350_v21 = vld [vmem:[%s2802_s1 + $0xe8] sm:$0xff] (!%p209_p3)  }
   0xc   : > { %v2343_v14 = vld [vmem:[%s2802_s1 + $0x18] sm:$0xff] (!%p209_p3)   ;;  %v2347_v18 = vld [vmem:[%s2802_s1 + $0x20] sm:$0xff] (!%p209_p3)   ;;  %v2351_v22 = vld [vmem:[%s2802_s1 + $0x28] sm:$0xff] (!%p209_p3)  }
   0xd   : > { %2084 = vmatpush3.bf16.msra.mxu0 (!%p209_p3), %v2335_v6  ;;  %v2344_v15 = vld [vmem:[%s2802_s1 + $0x98] sm:$0xff] (!%p209_p3)   ;;  %v2348_v19 = vld [vmem:[%s2802_s1 + $0xa0] sm:$0xff] (!%p209_p3)   ;;  %v2352_v23 = vld [vmem:[%s2802_s1 + $0xa8] sm:$0xff] (!%p209_p3)  }
   0xe   : > { %2196 = vmatpush3.bf16.msra.mxu1 %v2336_v7  ;;  %2085 = vmatprep.subr.bf16.mxu0 %v2337_v8  ;;  %s2811_s29 = smov (!%p256_p4, %s1814_s29), 63  ;;  %v2353_v24 = vld [vmem:[%s2802_s1 + $0x70] sm:$0xff]   ;;  %v2357_v28 = vld [vmem:[%s2802_s1 + $0x78] sm:$0xff]  }
   0xf   : > { %2197 = vmatprep.subr.bf16.mxu1 %v2338_v9  ;;  %v2354_v25 = vld [vmem:[%s2802_s1 + $0xf0] sm:$0xff]   ;;  %s1953_s30 = sshll.u32 %s2811_s29, 4  ;;  %v2358_v29 = vld [vmem:[%s2802_s1 + $0xf8] sm:$0xff]   ;;  %s1818_s21 = sshll.u32 %s2811_s29, 3 }
  0x10   : > { %v2355_v26 = vld [vmem:[%s2802_s1 + $0x30] sm:$0xff]   ;;  %s2623_s12 = scalar_lea.vmem %s2801_s0, %s1953_s30  ;;  %v2359_v30 = vld [vmem:[%s2802_s1 + $0x38] sm:$0xff]   ;;  %s2699_s24 = scalar_lea.vmem %s2803_s2, %s1818_s21 }
  0x11   : > { %2086 = vmatpush3.bf16.msra.mxu0 %v2339_v10  ;;  %v2356_v27 = vld [vmem:[%s2802_s1 + $0xb0] sm:$0xff]   ;;  %v2360_v31 = vld [vmem:[%s2802_s1 + $0xb8] sm:$0xff]   ;;  %s1820_s25 = sshll.u32 %s2811_s29, 2  ;;  %s2706_s28 = scalar_lea.vmem %s2805_s4, %s1818_s21 }
  0x12   : > { %2198 = vmatpush3.bf16.msra.mxu1 %v2340_v11  ;;  %2087 = vmatprep.subr.bf16.mxu0 %v2341_v12  ;;  %v2361_v32 = vld [vmem:[%s2623_s12] ss:$16 sps:$4 sm:$0xff]   ;;  %v2363_v33 = vld [vmem:[%s2623_s12 + $0x4] ss:$16 sps:$4 sm:$0xff]   ;;  %v2364_v34 = vld [vmem:[%s2623_s12 + $0x8] ss:$16 sps:$4 sm:$0xff]   ;;  %s2712_s6 = scalar_lea.vmem %s2804_s3, %s1820_s25 }
  0x13   : > { %2199 = vmatprep.subr.bf16.mxu1 %v2342_v13  ;;  %v2366_v35 = vld [vmem:[%s2623_s12 + $0xc] ss:$16 sps:$4 sm:$0xff]   ;;  %1031 = vmatprep.mubr.bf16.mxu0 %v2363_v33  ;;  %v2367_v36 = vld [vmem:[%s2623_s12 + $0x24] ss:$16 sps:$4 sm:$0xff]   ;;  %v2371_v38 = vld [vmem:[%s2623_s12 + $0x20] ss:$16 sps:$4 sm:$0xff]  }
  0x14   : > { %1192 = vmatprep.mubr.bf16.mxu1 %v2366_v35  ;;  %v2369_v37 = vld [vmem:[%s2623_s12 + $0x2c] ss:$16 sps:$4 sm:$0xff]   ;;  %v2372_v39 = vld [vmem:[%s2623_s12 + $0x28] ss:$16 sps:$4 sm:$0xff]   ;;  %v2373_v40 = vld [vmem:[%s2623_s12 + $0x44] ss:$16 sps:$4 sm:$0xff]  }
  0x15   : > { %2088 = vmatpush3.bf16.msra.mxu0 %v2343_v14  ;;  %v2375_v41 = vld [vmem:[%s2623_s12 + $0x4c] ss:$16 sps:$4 sm:$0xff]   ;;  %v2377_v42 = vld [vmem:[%s2623_s12 + $0x40] ss:$16 sps:$4 sm:$0xff]   ;;  %v2378_v43 = vld [vmem:[%s2623_s12 + $0x48] ss:$16 sps:$4 sm:$0xff]  }
  0x16   : > { %2200 = vmatpush3.bf16.msra.mxu1 %v2344_v15  ;;  %2089 = vmatprep.subr.bf16.mxu0 %v2345_v16  ;;  %v2379_v44 = vld [vmem:[%s2623_s12 + $0x64] ss:$16 sps:$4 sm:$0xff]   ;;  %v2381_v45 = vld [vmem:[%s2623_s12 + $0x6c] ss:$16 sps:$4 sm:$0xff]   ;;  %v2383_v46 = vld [vmem:[%s2623_s12 + $0x60] ss:$16 sps:$4 sm:$0xff]  }
  0x17   : > { %2201 = vmatprep.subr.bf16.mxu1 %v2346_v17  ;;  %v2384_v47 = vld [vmem:[%s2623_s12 + $0x68] ss:$16 sps:$4 sm:$0xff]   ;;  %v2385_v48 = vld [vmem:[%s2623_s12 + $0x84] ss:$16 sps:$4 sm:$0xff]   ;;  %v2387_v49 = vld [vmem:[%s2623_s12 + $0x8c] ss:$16 sps:$4 sm:$0xff]  }
  0x18   : > { %v2389_v50 = vld [vmem:[%s2623_s12 + $0x80] ss:$16 sps:$4 sm:$0xff]   ;;  %v2390_v51 = vld [vmem:[%s2623_s12 + $0x88] ss:$16 sps:$4 sm:$0xff]   ;;  %v2391_v52 = vld [vmem:[%s2623_s12 + $0xa4] ss:$16 sps:$4 sm:$0xff]  }
  0x19   : > { %2090 = vmatpush3.bf16.msra.mxu0 %v2347_v18  ;;  %v2393_v53 = vld [vmem:[%s2623_s12 + $0xac] ss:$16 sps:$4 sm:$0xff]   ;;  %v2395_v54 = vld [vmem:[%s2623_s12 + $0xa0] ss:$16 sps:$4 sm:$0xff]   ;;  %v2396_v55 = vld [vmem:[%s2623_s12 + $0xa8] ss:$16 sps:$4 sm:$0xff]  }
  0x1a   : > { %2202 = vmatpush3.bf16.msra.mxu1 %v2348_v19  ;;  %2091 = vmatprep.subr.bf16.mxu0 %v2349_v20  ;;  %v2397_v56 = vld [vmem:[%s2623_s12 + $0xc4] ss:$16 sps:$4 sm:$0xff]   ;;  %v2399_v57 = vld [vmem:[%s2623_s12 + $0xcc] ss:$16 sps:$4 sm:$0xff]   ;;  %v2401_v58 = vld [vmem:[%s2623_s12 + $0xc0] ss:$16 sps:$4 sm:$0xff]  }
  0x1b   : > { %2203 = vmatprep.subr.bf16.mxu1 %v2350_v21  ;;  %v2402_v59 = vld [vmem:[%s2623_s12 + $0xc8] ss:$16 sps:$4 sm:$0xff]   ;;  %v2403_v60 = vld [vmem:[%s2623_s12 + $0xe4] ss:$16 sps:$4 sm:$0xff]   ;;  %v2405_v61 = vld [vmem:[%s2623_s12 + $0xec] ss:$16 sps:$4 sm:$0xff]  }
  0x1c   : > { %v2407_v62 = vld [vmem:[%s2623_s12 + $0xe0] ss:$16 sps:$4 sm:$0xff]   ;;  %v2408_v63 = vld [vmem:[%s2623_s12 + $0xe8] ss:$16 sps:$4 sm:$0xff]   ;;  %v2409_v0 = vld [vmem:[%s2623_s12 + $0x104] ss:$16 sps:$4 sm:$0xff]  }
  0x1d   : > { %2092 = vmatpush3.bf16.msra.mxu0 %v2351_v22  ;;  %v2411_v1 = vld [vmem:[%s2623_s12 + $0x10c] ss:$16 sps:$4 sm:$0xff]   ;;  %v2413_v2 = vld [vmem:[%s2623_s12 + $0x100] ss:$16 sps:$4 sm:$0xff]   ;;  %v2414_v3 = vld [vmem:[%s2623_s12 + $0x108] ss:$16 sps:$4 sm:$0xff]  }
  0x1e   : > { %2204 = vmatpush3.bf16.msra.mxu1 %v2352_v23  ;;  %2093 = vmatprep.subr.bf16.mxu0 %v2353_v24  ;;  %v2415_v4 = vld [vmem:[%s2623_s12 + $0x124] ss:$16 sps:$4 sm:$0xff]   ;;  %v2417_v5 = vld [vmem:[%s2623_s12 + $0x12c] ss:$16 sps:$4 sm:$0xff]   ;;  %v2419_v6 = vld [vmem:[%s2623_s12 + $0x120] ss:$16 sps:$4 sm:$0xff]  }
  0x1f   : > { %2205 = vmatprep.subr.bf16.mxu1 %v2354_v25  ;;  %v2420_v7 = vld [vmem:[%s2623_s12 + $0x128] ss:$16 sps:$4 sm:$0xff]   ;;  %v2421_v8 = vld [vmem:[%s2623_s12 + $0x144] ss:$16 sps:$4 sm:$0xff]   ;;  %v2423_v9 = vld [vmem:[%s2623_s12 + $0x14c] ss:$16 sps:$4 sm:$0xff]  }
  0x20   : > { %v2425_v10 = vld [vmem:[%s2623_s12 + $0x140] ss:$16 sps:$4 sm:$0xff]   ;;  %v2426_v11 = vld [vmem:[%s2623_s12 + $0x148] ss:$16 sps:$4 sm:$0xff]   ;;  %v2427_v12 = vld [vmem:[%s2623_s12 + $0x164] ss:$16 sps:$4 sm:$0xff]  }
  0x21   : > { %2094 = vmatpush3.bf16.msra.mxu0 %v2355_v26  ;;  %v2429_v13 = vld [vmem:[%s2623_s12 + $0x16c] ss:$16 sps:$4 sm:$0xff]   ;;  %v2431_v14 = vld [vmem:[%s2623_s12 + $0x160] ss:$16 sps:$4 sm:$0xff]   ;;  %v2432_v15 = vld [vmem:[%s2623_s12 + $0x168] ss:$16 sps:$4 sm:$0xff]  }
  0x22   : > { %2206 = vmatpush3.bf16.msra.mxu1 %v2356_v27  ;;  %2095 = vmatprep.subr.bf16.mxu0 %v2357_v28  ;;  %v2433_v16 = vld [vmem:[%s2623_s12 + $0x184] ss:$16 sps:$4 sm:$0xff]   ;;  %v2435_v17 = vld [vmem:[%s2623_s12 + $0x18c] ss:$16 sps:$4 sm:$0xff]   ;;  %v2437_v18 = vld [vmem:[%s2623_s12 + $0x180] ss:$16 sps:$4 sm:$0xff]  }
  0x23   : > { %2207 = vmatprep.subr.bf16.mxu1 %v2358_v29  ;;  %v2438_v19 = vld [vmem:[%s2623_s12 + $0x188] ss:$16 sps:$4 sm:$0xff]   ;;  %v2439_v20 = vld [vmem:[%s2623_s12 + $0x1a4] ss:$16 sps:$4 sm:$0xff]   ;;  %v2441_v21 = vld [vmem:[%s2623_s12 + $0x1ac] ss:$16 sps:$4 sm:$0xff]  }
  0x24   : > { %v2443_v22 = vld [vmem:[%s2623_s12 + $0x1a0] ss:$16 sps:$4 sm:$0xff]   ;;  %v2444_v23 = vld [vmem:[%s2623_s12 + $0x1a8] ss:$16 sps:$4 sm:$0xff]   ;;  %v2445_v24 = vld [vmem:[%s2623_s12 + $0x1c4] ss:$16 sps:$4 sm:$0xff]  }
  0x25   : > { %2096 = vmatpush3.bf16.msra.mxu0 %v2359_v30  ;;  %v2447_v25 = vld [vmem:[%s2623_s12 + $0x1cc] ss:$16 sps:$4 sm:$0xff]   ;;  %v2449_v26 = vld [vmem:[%s2623_s12 + $0x1c0] ss:$16 sps:$4 sm:$0xff]   ;;  %v2450_v27 = vld [vmem:[%s2623_s12 + $0x1c8] ss:$16 sps:$4 sm:$0xff]  }
  0x26   : > { %2208 = vmatpush3.bf16.msra.mxu1 %v2360_v31  ;;  %v2451_v28 = vld [vmem:[%s2623_s12 + $0x1e4] ss:$16 sps:$4 sm:$0xff]   ;;  %v2453_v29 = vld [vmem:[%s2623_s12 + $0x1ec] ss:$16 sps:$4 sm:$0xff]   ;;  %v2455_v30 = vld [vmem:[%s2623_s12 + $0x1e0] ss:$16 sps:$4 sm:$0xff]  }
  0x27   : > { %v2456_v31 = vld [vmem:[%s2623_s12 + $0x1e8] ss:$16 sps:$4 sm:$0xff]  }
  0x28   : > { %1032 = vmatmul.mubr.bf16.vlgmr.msra.gmra.mrb[0].mxu0 %v2361_v32 }
  0x29   : > { %1193 = vmatmul.mubr.bf16.vlgmr.msra.gmra.mrb[0].mxu1 %v2364_v34  ;;  %1039 = vmatprep.mubr.bf16.mxu0 %v2367_v36 }
  0x2a   : > { %1200 = vmatprep.mubr.bf16.mxu1 %v2369_v37 }
  0x30   : > { %1040 = vmatmul.mubr.bf16.gmra.mrb[4].mxu0 %v2371_v38 }
  0x31   : > { %1201 = vmatmul.mubr.bf16.gmra.mrb[4].mxu1 %v2372_v39  ;;  %1047 = vmatprep.mubr.bf16.mxu0 %v2373_v40 }
  0x32   : > { %1208 = vmatprep.mubr.bf16.mxu1 %v2375_v41  ;;  %v1580_v41 = vld [vmem:[%s2699_s24] sm:$0xff] }
  0x38   : > { %1048 = vmatmul.mubr.bf16.gmra.mrb[8].mxu0 %v2377_v42 }
  0x39   : > { %1209 = vmatmul.mubr.bf16.gmra.mrb[8].mxu1 %v2378_v43  ;;  %1055 = vmatprep.mubr.bf16.mxu0 %v2379_v44 }
  0x3a   : > { %1216 = vmatprep.mubr.bf16.mxu1 %v2381_v45 }
  0x40   : > { %1056 = vmatmul.mubr.bf16.gmra.mrb[12].mxu0 %v2383_v46  ;;  %v1581_v46 = vld [vmem:[%s2699_s24 + $0x8] sm:$0xff] }
  0x41   : > { %1217 = vmatmul.mubr.bf16.gmra.mrb[12].mxu1 %v2384_v47  ;;  %1063 = vmatprep.mubr.bf16.mxu0 %v2385_v48 }
  0x42   : > { %1224 = vmatprep.mubr.bf16.mxu1 %v2387_v49 }
  0x48   : > { %1064 = vmatmul.mubr.bf16.gmra.mrb[16].mxu0 %v2389_v50 }
  0x49   : > { %1225 = vmatmul.mubr.bf16.gmra.mrb[16].mxu1 %v2390_v51  ;;  %1071 = vmatprep.mubr.bf16.mxu0 %v2391_v52 }
  0x4a   : > { %1232 = vmatprep.mubr.bf16.mxu1 %v2393_v53 }
  0x50   : > { %1072 = vmatmul.mubr.bf16.gmra.mrb[20].mxu0 %v2395_v54 }
  0x51   : > { %1233 = vmatmul.mubr.bf16.gmra.mrb[20].mxu1 %v2396_v55  ;;  %1079 = vmatprep.mubr.bf16.mxu0 %v2397_v56 }
  0x52   : > { %1240 = vmatprep.mubr.bf16.mxu1 %v2399_v57 }
  0x58   : > { %1080 = vmatmul.mubr.bf16.gmra.mrb[24].mxu0 %v2401_v58 }
  0x59   : > { %1241 = vmatmul.mubr.bf16.gmra.mrb[24].mxu1 %v2402_v59  ;;  %1087 = vmatprep.mubr.bf16.mxu0 %v2403_v60  ;;  %v1582_v60 = vld [vmem:[%s2699_s24 + $0x10] sm:$0xff] }
  0x5a   : > { %1248 = vmatprep.mubr.bf16.mxu1 %v2405_v61 }
  0x60   : > { %1088 = vmatmul.mubr.bf16.gmra.mrb[28].mxu0 %v2407_v62 }
  0x61   : > { %1249 = vmatmul.mubr.bf16.gmra.mrb[28].mxu1 %v2408_v63  ;;  %1095 = vmatprep.mubr.bf16.mxu0 %v2409_v0 }
  0x62   : > { %1256 = vmatprep.mubr.bf16.mxu1 %v2411_v1  ;;  %v1583_v1 = vld [vmem:[%s2699_s24 + $0x18] sm:$0xff] }
  0x68   : > { %1096 = vmatmul.mubr.bf16.gmra.mrb[32].mxu0 %v2413_v2 }
  0x69   : > { %1257 = vmatmul.mubr.bf16.gmra.mrb[32].mxu1 %v2414_v3  ;;  %1103 = vmatprep.mubr.bf16.mxu0 %v2415_v4 }
  0x6a   : > { %1264 = vmatprep.mubr.bf16.mxu1 %v2417_v5 }
  0x70   : > { %1104 = vmatmul.mubr.bf16.gmra.mrb[36].mxu0 %v2419_v6 }
  0x71   : > { %1265 = vmatmul.mubr.bf16.gmra.mrb[36].mxu1 %v2420_v7  ;;  %1111 = vmatprep.mubr.bf16.mxu0 %v2421_v8 }
  0x72   : > { %1272 = vmatprep.mubr.bf16.mxu1 %v2423_v9 }
  0x78   : > { %1112 = vmatmul.mubr.bf16.gmra.mrb[40].mxu0 %v2425_v10 }
  0x79   : > { %1273 = vmatmul.mubr.bf16.gmra.mrb[40].mxu1 %v2426_v11  ;;  %1119 = vmatprep.mubr.bf16.mxu0 %v2427_v12 }
  0x7a   : > { %1280 = vmatprep.mubr.bf16.mxu1 %v2429_v13 }
  0x80   : > { %1120 = vmatmul.mubr.bf16.gmra.mrb[44].mxu0 %v2431_v14 }
  0x81   : > { %1281 = vmatmul.mubr.bf16.gmra.mrb[44].mxu1 %v2432_v15  ;;  %1127 = vmatprep.mubr.bf16.mxu0 %v2433_v16  ;;  %v1584_v15 = vld [vmem:[%s2699_s24 + $0x20] sm:$0xff] }
  0x82   : > { %1288 = vmatprep.mubr.bf16.mxu1 %v2435_v17 }
  0x88   : > { %1128 = vmatmul.mubr.bf16.gmra.mrb[48].mxu0 %v2437_v18 }
  0x89   : > { %1289 = vmatmul.mubr.bf16.gmra.mrb[48].mxu1 %v2438_v19  ;;  %1135 = vmatprep.mubr.bf16.mxu0 %v2439_v20  ;;  %v1585_v20 = vld [vmem:[%s2699_s24 + $0x28] sm:$0xff] }
  0x8a   : > { %1296 = vmatprep.mubr.bf16.mxu1 %v2441_v21 }
  0x90   : > { %1136 = vmatmul.mubr.bf16.gmra.mrb[52].mxu0 %v2443_v22 }
  0x91   : > { %1297 = vmatmul.mubr.bf16.gmra.mrb[52].mxu1 %v2444_v23  ;;  %1143 = vmatprep.mubr.bf16.mxu0 %v2445_v24 }
  0x92   : > { %1304 = vmatprep.mubr.bf16.mxu1 %v2447_v25 }
  0x98   : > { %1144 = vmatmul.mubr.bf16.gmra.mrb[56].mxu0 %v2449_v26 }
  0x99   : > { %1305 = vmatmul.mubr.bf16.gmra.mrb[56].mxu1 %v2450_v27  ;;  %1151 = vmatprep.mubr.bf16.mxu0 %v2451_v28 }
  0x9a   : > { %1312 = vmatprep.mubr.bf16.mxu1 %v2453_v29 }
  0xa0   : > { %1152 = vmatmul.mubr.bf16.gmra.mrb[60].mxu0 %v2455_v30 }
  0xa1   : > { %1313 = vmatmul.mubr.bf16.gmra.mrb[60].mxu1 %v2456_v31 }
  0xfb   : > { %v2097_v32 = vpop.f32.mrb[0].mxu0 }
  0xfc   : > { %v2209_v33 = vpop.f32.mrb[0].mxu1  ;;  %v2098_v34 = vpop.f32.mrb[1].mxu0 }
  0xfd   : > { %v2099_v35 = vadd.f32 %v2098_v34, %v2097_v32  ;;  %v2210_v36 = vpop.f32.mrb[1].mxu1  ;;  %v2100_v37 = vpop.f32.mrb[2].mxu0  ;;  %v1586_v34 = vld [vmem:[%s2699_s24 + $0x30] sm:$0xff] }
  0xfe   : > { %v2211_v38 = vadd.f32 %v2210_v36, %v2209_v33  ;;  %v2212_v39 = vpop.f32.mrb[2].mxu1  ;;  %v2101_v40 = vpop.f32.mrb[3].mxu0 }
  0xff   : > { %v2102_v42 = vadd.f32 %v2101_v40, %v2100_v37  ;;  %v2213_v43 = vpop.f32.mrb[3].mxu1 }
 0x100   : > { %v1195_v44 = vadd.f32 %v2211_v38, %v2099_v35  ;;  %v2214_v45 = vadd.f32 %v2213_v43, %v2212_v39  ;;  %v1587_v39 = vld [vmem:[%s2699_s24 + $0x38] sm:$0xff] }
 0x102   : > { %v1612_v47 = vadd.f32 %v1580_v41, %v1195_v44  ;;  %v1198_v48 = vadd.f32 %v2214_v45, %v2102_v42 }
 0x103   : > { %v2103_v49 = vpop.f32.mrb[4].mxu0 }
 0x104   : > { %1644 = vst [vmem:[%s2706_s28] sm:$0xff] %v1612_v47  ;;  %v1989_v50 = vpack.c.bf16 %v1198_v48, %v1195_v44  ;;  %v1613_v51 = vadd.f32 %v1581_v46, %v1198_v48  ;;  %v2215_v52 = vpop.f32.mrb[4].mxu1  ;;  %v2104_v53 = vpop.f32.mrb[5].mxu0 }
 0x105   : > { %v2105_v54 = vadd.f32 %v2104_v53, %v2103_v49  ;;  %v2216_v55 = vpop.f32.mrb[5].mxu1  ;;  %v2106_v56 = vpop.f32.mrb[6].mxu0  ;;  %v1588_v53 = vld [vmem:[%s2699_s24 + $0x40] sm:$0xff] }
 0x106   : > { %1990 = vst [vmem:[%s2712_s6] sm:$0xff] %v1989_v50   ;;  %1645 = vst [vmem:[%s2706_s28 + $0x8] sm:$0xff] %v1613_v51  ;;  %v2217_v57 = vadd.f32 %v2216_v55, %v2215_v52  ;;  %v2218_v58 = vpop.f32.mrb[6].mxu1  ;;  %v2107_v59 = vpop.f32.mrb[7].mxu0 }
 0x107   : > { %v2108_v61 = vadd.f32 %v2107_v59, %v2106_v56  ;;  %v2219_v62 = vpop.f32.mrb[7].mxu1 }
 0x108   : > { %v1203_v63 = vadd.f32 %v2217_v57, %v2105_v54  ;;  %v2220_v0 = vadd.f32 %v2219_v62, %v2218_v58  ;;  %v1589_v58 = vld [vmem:[%s2699_s24 + $0x48] sm:$0xff] }
 0x10a   : > { %v1614_v2 = vadd.f32 %v1582_v60, %v1203_v63  ;;  %v1206_v3 = vadd.f32 %v2220_v0, %v2108_v61 }
 0x10b   : > { %v2109_v4 = vpop.f32.mrb[8].mxu0 }
 0x10c   : > { %1646 = vst [vmem:[%s2706_s28 + $0x10] sm:$0xff] %v1614_v2  ;;  %v1994_v5 = vpack.c.bf16 %v1206_v3, %v1203_v63  ;;  %v1615_v6 = vadd.f32 %v1583_v1, %v1206_v3  ;;  %v2221_v7 = vpop.f32.mrb[8].mxu1  ;;  %v2110_v8 = vpop.f32.mrb[9].mxu0 }
 0x10d   : > { %v2111_v9 = vadd.f32 %v2110_v8, %v2109_v4  ;;  %v2222_v10 = vpop.f32.mrb[9].mxu1  ;;  %v2112_v11 = vpop.f32.mrb[10].mxu0  ;;  %v1590_v8 = vld [vmem:[%s2699_s24 + $0x50] sm:$0xff] }
 0x10e   : > { %2066 = vst [vmem:[%s2712_s6 + $0x8] sm:$0xff] %v1994_v5   ;;  %1647 = vst [vmem:[%s2706_s28 + $0x18] sm:$0xff] %v1615_v6  ;;  %v2223_v12 = vadd.f32 %v2222_v10, %v2221_v7  ;;  %v2224_v13 = vpop.f32.mrb[10].mxu1  ;;  %v2113_v14 = vpop.f32.mrb[11].mxu0 }
 0x10f   : > { %v2114_v16 = vadd.f32 %v2113_v14, %v2112_v11  ;;  %v2225_v17 = vpop.f32.mrb[11].mxu1 }
 0x110   : > { %v1211_v18 = vadd.f32 %v2223_v12, %v2111_v9  ;;  %v2226_v19 = vadd.f32 %v2225_v17, %v2224_v13  ;;  %v1591_v13 = vld [vmem:[%s2699_s24 + $0x58] sm:$0xff] }
 0x112   : > { %v1616_v21 = vadd.f32 %v1584_v15, %v1211_v18  ;;  %v1214_v22 = vadd.f32 %v2226_v19, %v2114_v16 }
 0x113   : > { %v2115_v23 = vpop.f32.mrb[12].mxu0 }
 0x114   : > { %1648 = vst [vmem:[%s2706_s28 + $0x20] sm:$0xff] %v1616_v21  ;;  %v1999_v24 = vpack.c.bf16 %v1214_v22, %v1211_v18  ;;  %v1617_v25 = vadd.f32 %v1585_v20, %v1214_v22  ;;  %v2227_v26 = vpop.f32.mrb[12].mxu1  ;;  %v2116_v27 = vpop.f32.mrb[13].mxu0 }
 0x115   : > { %v2117_v28 = vadd.f32 %v2116_v27, %v2115_v23  ;;  %v2228_v29 = vpop.f32.mrb[13].mxu1  ;;  %v2118_v30 = vpop.f32.mrb[14].mxu0  ;;  %v1592_v27 = vld [vmem:[%s2699_s24 + $0x60] sm:$0xff] }
 0x116   : > { %2067 = vst [vmem:[%s2712_s6 + $0x10] sm:$0xff] %v1999_v24   ;;  %1649 = vst [vmem:[%s2706_s28 + $0x28] sm:$0xff] %v1617_v25  ;;  %v2229_v31 = vadd.f32 %v2228_v29, %v2227_v26  ;;  %v2230_v32 = vpop.f32.mrb[14].mxu1  ;;  %v2119_v33 = vpop.f32.mrb[15].mxu0 }
 0x117   : > { %v2120_v35 = vadd.f32 %v2119_v33, %v2118_v30  ;;  %v2231_v36 = vpop.f32.mrb[15].mxu1 }
 0x118   : > { %v1219_v37 = vadd.f32 %v2229_v31, %v2117_v28  ;;  %v2232_v38 = vadd.f32 %v2231_v36, %v2230_v32  ;;  %v1593_v32 = vld [vmem:[%s2699_s24 + $0x68] sm:$0xff] }
 0x11a   : > { %v1618_v40 = vadd.f32 %v1586_v34, %v1219_v37  ;;  %v1222_v41 = vadd.f32 %v2232_v38, %v2120_v35 }
 0x11b   : > { %v2121_v42 = vpop.f32.mrb[16].mxu0 }
 0x11c   : > { %1650 = vst [vmem:[%s2706_s28 + $0x30] sm:$0xff] %v1618_v40  ;;  %v2004_v43 = vpack.c.bf16 %v1222_v41, %v1219_v37  ;;  %v1619_v44 = vadd.f32 %v1587_v39, %v1222_v41  ;;  %v2233_v45 = vpop.f32.mrb[16].mxu1  ;;  %v2122_v46 = vpop.f32.mrb[17].mxu0 }
 0x11d   : > { %v2123_v47 = vadd.f32 %v2122_v46, %v2121_v42  ;;  %v2234_v48 = vpop.f32.mrb[17].mxu1  ;;  %v2124_v49 = vpop.f32.mrb[18].mxu0  ;;  %v1594_v46 = vld [vmem:[%s2699_s24 + $0x70] sm:$0xff] }
 0x11e   : > { %2068 = vst [vmem:[%s2712_s6 + $0x18] sm:$0xff] %v2004_v43   ;;  %1651 = vst [vmem:[%s2706_s28 + $0x38] sm:$0xff] %v1619_v44  ;;  %v2235_v50 = vadd.f32 %v2234_v48, %v2233_v45  ;;  %v2236_v51 = vpop.f32.mrb[18].mxu1  ;;  %v2125_v52 = vpop.f32.mrb[19].mxu0 }
 0x11f   : > { %v2126_v54 = vadd.f32 %v2125_v52, %v2124_v49  ;;  %v2237_v55 = vpop.f32.mrb[19].mxu1 }
 0x120   : > { %v1227_v56 = vadd.f32 %v2235_v50, %v2123_v47  ;;  %v2238_v57 = vadd.f32 %v2237_v55, %v2236_v51  ;;  %v1595_v51 = vld [vmem:[%s2699_s24 + $0x78] sm:$0xff] }
 0x122   : > { %v1620_v59 = vadd.f32 %v1588_v53, %v1227_v56  ;;  %v1230_v60 = vadd.f32 %v2238_v57, %v2126_v54 }
 0x123   : > { %v2127_v61 = vpop.f32.mrb[20].mxu0 }
 0x124   : > { %1652 = vst [vmem:[%s2706_s28 + $0x40] sm:$0xff] %v1620_v59  ;;  %v2009_v62 = vpack.c.bf16 %v1230_v60, %v1227_v56  ;;  %v1621_v63 = vadd.f32 %v1589_v58, %v1230_v60  ;;  %v2239_v0 = vpop.f32.mrb[20].mxu1  ;;  %v2128_v1 = vpop.f32.mrb[21].mxu0 }
 0x125   : > { %v2129_v2 = vadd.f32 %v2128_v1, %v2127_v61  ;;  %v2240_v3 = vpop.f32.mrb[21].mxu1  ;;  %v2130_v4 = vpop.f32.mrb[22].mxu0  ;;  %v1596_v1 = vld [vmem:[%s2699_s24 + $0x80] sm:$0xff] }
 0x126   : > { %2069 = vst [vmem:[%s2712_s6 + $0x20] sm:$0xff] %v2009_v62   ;;  %1653 = vst [vmem:[%s2706_s28 + $0x48] sm:$0xff] %v1621_v63  ;;  %v2241_v5 = vadd.f32 %v2240_v3, %v2239_v0  ;;  %v2242_v6 = vpop.f32.mrb[22].mxu1  ;;  %v2131_v7 = vpop.f32.mrb[23].mxu0 }
 0x127   : > { %v2132_v9 = vadd.f32 %v2131_v7, %v2130_v4  ;;  %v2243_v10 = vpop.f32.mrb[23].mxu1 }
 0x128   : > { %v1235_v11 = vadd.f32 %v2241_v5, %v2129_v2  ;;  %v2244_v12 = vadd.f32 %v2243_v10, %v2242_v6  ;;  %v1597_v6 = vld [vmem:[%s2699_s24 + $0x88] sm:$0xff] }
 0x12a   : > { %v1622_v14 = vadd.f32 %v1590_v8, %v1235_v11  ;;  %v1238_v15 = vadd.f32 %v2244_v12, %v2132_v9 }
 0x12b   : > { %v2133_v16 = vpop.f32.mrb[24].mxu0 }
 0x12c   : > { %1654 = vst [vmem:[%s2706_s28 + $0x50] sm:$0xff] %v1622_v14  ;;  %v2014_v17 = vpack.c.bf16 %v1238_v15, %v1235_v11  ;;  %v1623_v18 = vadd.f32 %v1591_v13, %v1238_v15  ;;  %v2245_v19 = vpop.f32.mrb[24].mxu1  ;;  %v2134_v20 = vpop.f32.mrb[25].mxu0 }
 0x12d   : > { %v2135_v21 = vadd.f32 %v2134_v20, %v2133_v16  ;;  %v2246_v22 = vpop.f32.mrb[25].mxu1  ;;  %v2136_v23 = vpop.f32.mrb[26].mxu0  ;;  %v1598_v20 = vld [vmem:[%s2699_s24 + $0x90] sm:$0xff] }
 0x12e   : > { %2070 = vst [vmem:[%s2712_s6 + $0x28] sm:$0xff] %v2014_v17   ;;  %1655 = vst [vmem:[%s2706_s28 + $0x58] sm:$0xff] %v1623_v18  ;;  %v2247_v24 = vadd.f32 %v2246_v22, %v2245_v19  ;;  %v2248_v25 = vpop.f32.mrb[26].mxu1  ;;  %v2137_v26 = vpop.f32.mrb[27].mxu0 }
 0x12f   : > { %v2138_v28 = vadd.f32 %v2137_v26, %v2136_v23  ;;  %v2249_v29 = vpop.f32.mrb[27].mxu1 }
 0x130   : > { %v1243_v30 = vadd.f32 %v2247_v24, %v2135_v21  ;;  %v2250_v31 = vadd.f32 %v2249_v29, %v2248_v25  ;;  %v1599_v25 = vld [vmem:[%s2699_s24 + $0x98] sm:$0xff] }
 0x132   : > { %v1624_v33 = vadd.f32 %v1592_v27, %v1243_v30  ;;  %v1246_v34 = vadd.f32 %v2250_v31, %v2138_v28 }
 0x133   : > { %v2139_v35 = vpop.f32.mrb[28].mxu0 }
 0x134   : > { %1656 = vst [vmem:[%s2706_s28 + $0x60] sm:$0xff] %v1624_v33  ;;  %v2019_v36 = vpack.c.bf16 %v1246_v34, %v1243_v30  ;;  %v1625_v37 = vadd.f32 %v1593_v32, %v1246_v34  ;;  %v2251_v38 = vpop.f32.mrb[28].mxu1  ;;  %v2140_v39 = vpop.f32.mrb[29].mxu0 }
 0x135   : > { %v2141_v40 = vadd.f32 %v2140_v39, %v2139_v35  ;;  %v2252_v41 = vpop.f32.mrb[29].mxu1  ;;  %v2142_v42 = vpop.f32.mrb[30].mxu0  ;;  %v1600_v39 = vld [vmem:[%s2699_s24 + $0xa0] sm:$0xff] }
 0x136   : > { %2071 = vst [vmem:[%s2712_s6 + $0x30] sm:$0xff] %v2019_v36   ;;  %1657 = vst [vmem:[%s2706_s28 + $0x68] sm:$0xff] %v1625_v37  ;;  %v2253_v43 = vadd.f32 %v2252_v41, %v2251_v38  ;;  %v2254_v44 = vpop.f32.mrb[30].mxu1  ;;  %v2143_v45 = vpop.f32.mrb[31].mxu0 }
 0x137   : > { %v2144_v47 = vadd.f32 %v2143_v45, %v2142_v42  ;;  %v2255_v48 = vpop.f32.mrb[31].mxu1 }
 0x138   : > { %v1251_v49 = vadd.f32 %v2253_v43, %v2141_v40  ;;  %v2256_v50 = vadd.f32 %v2255_v48, %v2254_v44  ;;  %v1601_v44 = vld [vmem:[%s2699_s24 + $0xa8] sm:$0xff] }
 0x13a   : > { %v1626_v52 = vadd.f32 %v1594_v46, %v1251_v49  ;;  %v1254_v53 = vadd.f32 %v2256_v50, %v2144_v47 }
 0x13b   : > { %v2145_v54 = vpop.f32.mrb[32].mxu0 }
 0x13c   : > { %1658 = vst [vmem:[%s2706_s28 + $0x70] sm:$0xff] %v1626_v52  ;;  %v2024_v55 = vpack.c.bf16 %v1254_v53, %v1251_v49  ;;  %v1627_v56 = vadd.f32 %v1595_v51, %v1254_v53  ;;  %v2257_v57 = vpop.f32.mrb[32].mxu1  ;;  %v2146_v58 = vpop.f32.mrb[33].mxu0 }
 0x13d   : > { %v2147_v59 = vadd.f32 %v2146_v58, %v2145_v54  ;;  %v2258_v60 = vpop.f32.mrb[33].mxu1  ;;  %v2148_v61 = vpop.f32.mrb[34].mxu0  ;;  %v1602_v58 = vld [vmem:[%s2699_s24 + $0xb0] sm:$0xff] }
 0x13e   : > { %2072 = vst [vmem:[%s2712_s6 + $0x38] sm:$0xff] %v2024_v55   ;;  %1659 = vst [vmem:[%s2706_s28 + $0x78] sm:$0xff] %v1627_v56  ;;  %v2259_v62 = vadd.f32 %v2258_v60, %v2257_v57  ;;  %v2260_v63 = vpop.f32.mrb[34].mxu1  ;;  %v2149_v0 = vpop.f32.mrb[35].mxu0 }
 0x13f   : > { %v2150_v2 = vadd.f32 %v2149_v0, %v2148_v61  ;;  %v2261_v3 = vpop.f32.mrb[35].mxu1 }
 0x140   : > { %v1259_v4 = vadd.f32 %v2259_v62, %v2147_v59  ;;  %v2262_v5 = vadd.f32 %v2261_v3, %v2260_v63  ;;  %v1603_v63 = vld [vmem:[%s2699_s24 + $0xb8] sm:$0xff] }
 0x142   : > { %v1628_v7 = vadd.f32 %v1596_v1, %v1259_v4  ;;  %v1262_v8 = vadd.f32 %v2262_v5, %v2150_v2 }
 0x143   : > { %v2151_v9 = vpop.f32.mrb[36].mxu0 }
 0x144   : > { %1660 = vst [vmem:[%s2706_s28 + $0x80] sm:$0xff] %v1628_v7  ;;  %v2029_v10 = vpack.c.bf16 %v1262_v8, %v1259_v4  ;;  %v1629_v11 = vadd.f32 %v1597_v6, %v1262_v8  ;;  %v2263_v12 = vpop.f32.mrb[36].mxu1  ;;  %v2152_v13 = vpop.f32.mrb[37].mxu0 }
 0x145   : > { %v2153_v14 = vadd.f32 %v2152_v13, %v2151_v9  ;;  %v2264_v15 = vpop.f32.mrb[37].mxu1  ;;  %v2154_v16 = vpop.f32.mrb[38].mxu0  ;;  %v1604_v13 = vld [vmem:[%s2699_s24 + $0xc0] sm:$0xff] }
 0x146   : > { %2073 = vst [vmem:[%s2712_s6 + $0x40] sm:$0xff] %v2029_v10   ;;  %1661 = vst [vmem:[%s2706_s28 + $0x88] sm:$0xff] %v1629_v11  ;;  %v2265_v17 = vadd.f32 %v2264_v15, %v2263_v12  ;;  %v2266_v18 = vpop.f32.mrb[38].mxu1  ;;  %v2155_v19 = vpop.f32.mrb[39].mxu0 }
 0x147   : > { %v2156_v21 = vadd.f32 %v2155_v19, %v2154_v16  ;;  %v2267_v22 = vpop.f32.mrb[39].mxu1 }
 0x148   : > { %v1267_v23 = vadd.f32 %v2265_v17, %v2153_v14  ;;  %v2268_v24 = vadd.f32 %v2267_v22, %v2266_v18  ;;  %v1605_v18 = vld [vmem:[%s2699_s24 + $0xc8] sm:$0xff] }
 0x14a   : > { %v1630_v26 = vadd.f32 %v1598_v20, %v1267_v23  ;;  %v1270_v27 = vadd.f32 %v2268_v24, %v2156_v21 }
 0x14b   : > { %v2157_v28 = vpop.f32.mrb[40].mxu0 }
 0x14c   : > { %1662 = vst [vmem:[%s2706_s28 + $0x90] sm:$0xff] %v1630_v26  ;;  %v2034_v29 = vpack.c.bf16 %v1270_v27, %v1267_v23  ;;  %v1631_v30 = vadd.f32 %v1599_v25, %v1270_v27  ;;  %v2269_v31 = vpop.f32.mrb[40].mxu1  ;;  %v2158_v32 = vpop.f32.mrb[41].mxu0 }
 0x14d   : > { %v2159_v33 = vadd.f32 %v2158_v32, %v2157_v28  ;;  %v2270_v34 = vpop.f32.mrb[41].mxu1  ;;  %v2160_v35 = vpop.f32.mrb[42].mxu0  ;;  %v1606_v32 = vld [vmem:[%s2699_s24 + $0xd0] sm:$0xff] }
 0x14e   : > { %2074 = vst [vmem:[%s2712_s6 + $0x48] sm:$0xff] %v2034_v29   ;;  %1663 = vst [vmem:[%s2706_s28 + $0x98] sm:$0xff] %v1631_v30  ;;  %v2271_v36 = vadd.f32 %v2270_v34, %v2269_v31  ;;  %v2272_v37 = vpop.f32.mrb[42].mxu1  ;;  %v2161_v38 = vpop.f32.mrb[43].mxu0 }
 0x14f   : > { %v2162_v40 = vadd.f32 %v2161_v38, %v2160_v35  ;;  %v2273_v41 = vpop.f32.mrb[43].mxu1 }
 0x150   : > { %v1275_v42 = vadd.f32 %v2271_v36, %v2159_v33  ;;  %v2274_v43 = vadd.f32 %v2273_v41, %v2272_v37  ;;  %v1607_v37 = vld [vmem:[%s2699_s24 + $0xd8] sm:$0xff] }
 0x152   : > { %v1632_v45 = vadd.f32 %v1600_v39, %v1275_v42  ;;  %v1278_v46 = vadd.f32 %v2274_v43, %v2162_v40 }
 0x153   : > { %v2163_v47 = vpop.f32.mrb[44].mxu0 }
 0x154   : > { %1664 = vst [vmem:[%s2706_s28 + $0xa0] sm:$0xff] %v1632_v45  ;;  %v2039_v48 = vpack.c.bf16 %v1278_v46, %v1275_v42  ;;  %v1633_v49 = vadd.f32 %v1601_v44, %v1278_v46  ;;  %v2275_v50 = vpop.f32.mrb[44].mxu1  ;;  %v2164_v51 = vpop.f32.mrb[45].mxu0 }
 0x155   : > { %v2165_v52 = vadd.f32 %v2164_v51, %v2163_v47  ;;  %v2276_v53 = vpop.f32.mrb[45].mxu1  ;;  %v2166_v54 = vpop.f32.mrb[46].mxu0  ;;  %v1608_v51 = vld [vmem:[%s2699_s24 + $0xe0] sm:$0xff] }
 0x156   : > { %2075 = vst [vmem:[%s2712_s6 + $0x50] sm:$0xff] %v2039_v48   ;;  %1665 = vst [vmem:[%s2706_s28 + $0xa8] sm:$0xff] %v1633_v49  ;;  %v2277_v55 = vadd.f32 %v2276_v53, %v2275_v50  ;;  %v2278_v56 = vpop.f32.mrb[46].mxu1  ;;  %v2167_v57 = vpop.f32.mrb[47].mxu0 }
 0x157   : > { %v2168_v59 = vadd.f32 %v2167_v57, %v2166_v54  ;;  %v2279_v60 = vpop.f32.mrb[47].mxu1 }
 0x158   : > { %v1283_v61 = vadd.f32 %v2277_v55, %v2165_v52  ;;  %v2280_v62 = vadd.f32 %v2279_v60, %v2278_v56  ;;  %v1609_v56 = vld [vmem:[%s2699_s24 + $0xe8] sm:$0xff] }
 0x15a   : > { %v1634_v0 = vadd.f32 %v1602_v58, %v1283_v61  ;;  %v1286_v1 = vadd.f32 %v2280_v62, %v2168_v59 }
 0x15b   : > { %v2169_v2 = vpop.f32.mrb[48].mxu0 }
 0x15c   : > { %1666 = vst [vmem:[%s2706_s28 + $0xb0] sm:$0xff] %v1634_v0  ;;  %v2044_v3 = vpack.c.bf16 %v1286_v1, %v1283_v61  ;;  %v1635_v4 = vadd.f32 %v1603_v63, %v1286_v1  ;;  %v2281_v5 = vpop.f32.mrb[48].mxu1  ;;  %v2170_v6 = vpop.f32.mrb[49].mxu0 }
 0x15d   : > { %v2171_v7 = vadd.f32 %v2170_v6, %v2169_v2  ;;  %v2282_v8 = vpop.f32.mrb[49].mxu1  ;;  %v2172_v9 = vpop.f32.mrb[50].mxu0  ;;  %v1610_v6 = vld [vmem:[%s2699_s24 + $0xf0] sm:$0xff] }
 0x15e   : > { %2076 = vst [vmem:[%s2712_s6 + $0x58] sm:$0xff] %v2044_v3   ;;  %1667 = vst [vmem:[%s2706_s28 + $0xb8] sm:$0xff] %v1635_v4  ;;  %v2283_v10 = vadd.f32 %v2282_v8, %v2281_v5  ;;  %v2284_v11 = vpop.f32.mrb[50].mxu1  ;;  %v2173_v12 = vpop.f32.mrb[51].mxu0 }
 0x15f   : > { %v2174_v14 = vadd.f32 %v2173_v12, %v2172_v9  ;;  %v2285_v15 = vpop.f32.mrb[51].mxu1 }
 0x160   : > { %v1291_v16 = vadd.f32 %v2283_v10, %v2171_v7  ;;  %v2286_v17 = vadd.f32 %v2285_v15, %v2284_v11  ;;  %v1611_v11 = vld [vmem:[%s2699_s24 + $0xf8] sm:$0xff] }
 0x162   : > { %v1636_v19 = vadd.f32 %v1604_v13, %v1291_v16  ;;  %v1294_v20 = vadd.f32 %v2286_v17, %v2174_v14 }
 0x163   : > { %v2175_v21 = vpop.f32.mrb[52].mxu0 }
 0x164   : > { %1668 = vst [vmem:[%s2706_s28 + $0xc0] sm:$0xff] %v1636_v19  ;;  %v2049_v22 = vpack.c.bf16 %v1294_v20, %v1291_v16  ;;  %v1637_v23 = vadd.f32 %v1605_v18, %v1294_v20  ;;  %v2287_v24 = vpop.f32.mrb[52].mxu1  ;;  %v2176_v25 = vpop.f32.mrb[53].mxu0 }
 0x165   : > { %v2177_v26 = vadd.f32 %v2176_v25, %v2175_v21  ;;  %v2288_v27 = vpop.f32.mrb[53].mxu1  ;;  %v2178_v28 = vpop.f32.mrb[54].mxu0 }
 0x166   : > { %2077 = vst [vmem:[%s2712_s6 + $0x60] sm:$0xff] %v2049_v22   ;;  %1669 = vst [vmem:[%s2706_s28 + $0xc8] sm:$0xff] %v1637_v23  ;;  %v2289_v29 = vadd.f32 %v2288_v27, %v2287_v24  ;;  %v2290_v30 = vpop.f32.mrb[54].mxu1  ;;  %v2179_v31 = vpop.f32.mrb[55].mxu0 }
 0x167   : > { %v2180_v33 = vadd.f32 %v2179_v31, %v2178_v28  ;;  %v2291_v34 = vpop.f32.mrb[55].mxu1 }
 0x168   : > { %v1299_v35 = vadd.f32 %v2289_v29, %v2177_v26  ;;  %v2292_v36 = vadd.f32 %v2291_v34, %v2290_v30 }
 0x16a   : > { %v1638_v38 = vadd.f32 %v1606_v32, %v1299_v35  ;;  %v1302_v39 = vadd.f32 %v2292_v36, %v2180_v33 }
 0x16b   : > { %v2181_v40 = vpop.f32.mrb[56].mxu0 }
 0x16c   : > { %1670 = vst [vmem:[%s2706_s28 + $0xd0] sm:$0xff] %v1638_v38  ;;  %v2054_v41 = vpack.c.bf16 %v1302_v39, %v1299_v35  ;;  %v1639_v42 = vadd.f32 %v1607_v37, %v1302_v39  ;;  %v2293_v43 = vpop.f32.mrb[56].mxu1  ;;  %v2182_v44 = vpop.f32.mrb[57].mxu0 }
 0x16d   : > { %v2183_v45 = vadd.f32 %v2182_v44, %v2181_v40  ;;  %v2294_v46 = vpop.f32.mrb[57].mxu1  ;;  %v2184_v47 = vpop.f32.mrb[58].mxu0 }
 0x16e   : > { %2078 = vst [vmem:[%s2712_s6 + $0x68] sm:$0xff] %v2054_v41   ;;  %1671 = vst [vmem:[%s2706_s28 + $0xd8] sm:$0xff] %v1639_v42  ;;  %v2295_v48 = vadd.f32 %v2294_v46, %v2293_v43  ;;  %v2296_v49 = vpop.f32.mrb[58].mxu1  ;;  %v2185_v50 = vpop.f32.mrb[59].mxu0 }
 0x16f   : > { %v2186_v52 = vadd.f32 %v2185_v50, %v2184_v47  ;;  %v2297_v53 = vpop.f32.mrb[59].mxu1 }
 0x170   : > { %v1307_v54 = vadd.f32 %v2295_v48, %v2183_v45  ;;  %v2298_v55 = vadd.f32 %v2297_v53, %v2296_v49 }
 0x172   : > { %v1640_v57 = vadd.f32 %v1608_v51, %v1307_v54  ;;  %v1310_v58 = vadd.f32 %v2298_v55, %v2186_v52 }
 0x173   : > { %v2187_v59 = vpop.f32.mrb[60].mxu0 }
 0x174   : > { %1672 = vst [vmem:[%s2706_s28 + $0xe0] sm:$0xff] %v1640_v57  ;;  %v2059_v60 = vpack.c.bf16 %v1310_v58, %v1307_v54  ;;  %v1641_v61 = vadd.f32 %v1609_v56, %v1310_v58  ;;  %v2299_v62 = vpop.f32.mrb[60].mxu1  ;;  %v2188_v63 = vpop.f32.mrb[61].mxu0 }
 0x175   : > { %v2189_v0 = vadd.f32 %v2188_v63, %v2187_v59  ;;  %v2300_v1 = vpop.f32.mrb[61].mxu1  ;;  %v2190_v2 = vpop.f32.mrb[62].mxu0 }
 0x176   : > { %2079 = vst [vmem:[%s2712_s6 + $0x70] sm:$0xff] %v2059_v60   ;;  %1673 = vst [vmem:[%s2706_s28 + $0xe8] sm:$0xff] %v1641_v61  ;;  %v2301_v3 = vadd.f32 %v2300_v1, %v2299_v62  ;;  %v2302_v4 = vpop.f32.mrb[62].mxu1  ;;  %v2191_v5 = vpop.f32.mrb[63].mxu0 }
 0x177   : > { %v2192_v7 = vadd.f32 %v2191_v5, %v2190_v2  ;;  %v2303_v8 = vpop.f32.mrb[63].mxu1 }
 0x178   : > { %v1315_v9 = vadd.f32 %v2301_v3, %v2189_v0  ;;  %v2304_v10 = vadd.f32 %v2303_v8, %v2302_v4 }
 0x17a   : > { %v1642_v12 = vadd.f32 %v1610_v6, %v1315_v9  ;;  %v1318_v13 = vadd.f32 %v2304_v10, %v2192_v7 }
 0x17c   : > { %1674 = vst [vmem:[%s2706_s28 + $0xf0] sm:$0xff] %v1642_v12  ;;  %v2064_v14 = vpack.c.bf16 %v1318_v13, %v1315_v9  ;;  %v1643_v15 = vadd.f32 %v1611_v11, %v1318_v13 }
 0x17e   : > { %2080 = vst [vmem:[%s2712_s6 + $0x78] sm:$0xff] %v2064_v14   ;;  %1675 = vst [vmem:[%s2706_s28 + $0xf8] sm:$0xff] %v1643_v15 }
 0x17f PF: > { %s15_s17 = sadd.s32 1, %s2479_s17   ;;  %s2806_s15 = smov %s2475_s16 }
 0x180   : > { %p12_p5 = scmp.ge.s32.totalorder %s15_s17, 4   ;;  %s2807_s16 = smov %s2809_s18 }
 0x182   :  { %14 = sbr.rel (!%p12_p5) target bundleno = 2 (0x2), region = 88 }

</bundles_post_ra>
